<compile_context>
chip_gen: v6e
topology: v6e:2x2x1
jax: 0.10.0
libtpu: 0.0.40
codegen_flags: <defaults>
</compile_context>

<pallas_src>
import functools

import jax
import jax.numpy as jnp
from jax.experimental import pallas as pl
from jax.experimental.pallas import tpu as pltpu


# ----------------------------- model config -----------------------------

class Config:
    vocab_size = 100
    hidden_size = 32
    num_heads = 2
    num_layers = 2
    intermediate_size = 64
    max_position = 16
    type_vocab = 2
    initializer_range = 0.02
    layer_norm_eps = 1e-12


# ----------------------------- kernel helpers -----------------------------

def _layer_norm(x, g, b, eps):
    mu = jnp.mean(x, axis=-1, keepdims=True)
    xc = x - mu
    var = jnp.mean(xc * xc, axis=-1, keepdims=True)
    return xc * jax.lax.rsqrt(var + eps) * g + b


def _softmax_rows(s):
    s = s - jnp.max(s, axis=-1, keepdims=True)
    p = jnp.exp(s)
    # approx=True -> EUP vrcp slot (otherwise idle), off the VALU critical path
    return p * pl.reciprocal(jnp.sum(p, axis=-1, keepdims=True), approx=True)


# ----------------------------- fused Pallas kernel -----------------------------

def _fused_bert_kernel(
    ids_ref, mask_ref,
    word_emb_ref, pos_type_ref, emb_ln_g_ref, emb_ln_b_ref,
    wqkv_ref, bqkv_ref, wo_ref, bo_ref, ln1_g_ref, ln1_b_ref,
    wi_ref, bi_ref, wf_ref, bf_ref, ln2_g_ref, ln2_b_ref,
    pooler_w_ref, pooler_b_ref,
    last_ref, pooled_ref,
    *, L, B, S, H, Hh, Dh, I, V, eps,
):
    f32 = jnp.float32
    BS = B * S

    # ---- fused embedding lookup: one-hot gather as a single MXU matmul ----
    ids = ids_ref[...]                                                  # [BS, 1] i32
    onehot = (jax.lax.broadcasted_iota(jnp.int32, (BS, V), 1) == ids).astype(f32)
    word = jnp.dot(onehot, word_emb_ref[...], preferred_element_type=f32)   # [BS, H]
    pos_type = pos_type_ref[0:S, :]                                     # [S, H]
    emb = word + jnp.concatenate([pos_type] * B, axis=0)                # [BS, H]
    h = _layer_norm(emb, emb_ln_g_ref[...], emb_ln_b_ref[...], eps)

    # ---- additive attention mask: built ONCE, reused by every layer ----
    addm = (1.0 - mask_ref[...].astype(f32)) * -1e9                     # [B, S]
    bmask = jnp.broadcast_to(addm[:, None, :], (B, S, S))               # [B, S, S]
    amask = jnp.concatenate([bmask] * Hh, axis=0)                       # [Hh*B, S, S]

    # ---- encoder layers: static unrolled loop, everything stays in VMEM ----
    for l in range(L):
        # fused QKV projection (1/sqrt(Dh) is folded into Wq at init)
        qkv = jnp.dot(h, wqkv_ref[l], preferred_element_type=f32) + bqkv_ref[l]  # [BS, 3H]
        qkv3 = qkv.reshape(B, S, 3 * H)                                 # leading-dim split only

        def heads(base):
            # stack heads along the leading (batch) axis: index = hd*B + b
            return jnp.concatenate(
                [qkv3[:, :, base + hd * Dh: base + (hd + 1) * Dh] for hd in range(Hh)],
                axis=0)                                                 # [Hh*B, S, Dh]

        q = heads(0)
        k = heads(H)
        v = heads(2 * H)

        # two batched matmuls for the whole attention of this layer
        s = jnp.einsum('bqd,bkd->bqk', q, k, preferred_element_type=f32) + amask
        p = _softmax_rows(s)
        ctx3 = jnp.einsum('bqk,bkd->bqd', p, v, preferred_element_type=f32)  # [Hh*B, S, Dh]
        ctx = jnp.concatenate(
            [ctx3[hd * B:(hd + 1) * B].reshape(BS, Dh) for hd in range(Hh)],
            axis=1)                                                     # [BS, H]

        # output projection + residual + LayerNorm
        attn_out = jnp.dot(ctx, wo_ref[l], preferred_element_type=f32) + bo_ref[l]
        h = _layer_norm(h + attn_out, ln1_g_ref[l], ln1_b_ref[l], eps)

        # feed-forward + residual + LayerNorm
        inter = jnp.dot(h, wi_ref[l], preferred_element_type=f32) + bi_ref[l]
        # TODO(synk): HF BERT default GELU is the exact erf form; tanh approximation
        # kept here for robust Mosaic lowering (differences ~1e-3 with these weights).
        inter = jax.nn.gelu(inter, approximate=True)
        ffn_out = jnp.dot(inter, wf_ref[l], preferred_element_type=f32) + bf_ref[l]
        h = _layer_norm(h + ffn_out, ln2_g_ref[l], ln2_b_ref[l], eps)

    # TODO(synk): `last` keeps its natural [B*S, 32] layout (masked vst); packing it
    # into a 128-lane slab needs an in-kernel (16,32)->(4,128) relayout whose cost/risk
    # outweighs the store saving at this size.
    last_ref[...] = h.astype(last_ref.dtype)

    # pooler: pick the [CLS] row of each batch with one tiny selection matmul
    row = jax.lax.broadcasted_iota(jnp.int32, (B, BS), 1)
    tgt = S * jax.lax.broadcasted_iota(jnp.int32, (B, BS), 0)
    sel = (row == tgt).astype(f32)                                      # [B, BS]
    cls = jnp.dot(sel, h, preferred_element_type=f32)                   # [B, H]
    pooled = jnp.tanh(jnp.dot(cls, pooler_w_ref[...], preferred_element_type=f32)
                      + pooler_b_ref[...])
    pooled_ref[...] = pooled.astype(pooled_ref.dtype)


# ----------------------------- parameters -----------------------------

def init_params(key, cfg, reinit_n_layers=1):
    """Deterministic init emulating _do_reinit (Linear weights ~ N(0, initializer_range),
    zero biases, LN weight=1 / bias=0).  NOTE: with no pretrained weights available, every
    layer gets this init regardless of `reinit_n_layers` (kept only for API parity)."""
    std = cfg.initializer_range
    H, I, L = cfg.hidden_size, cfg.intermediate_size, cfg.num_layers
    Dh = H // cfg.num_heads
    scale = 1.0 / (Dh ** 0.5)

    def normal(k, shape):
        return std * jax.random.normal(k, shape, dtype=jnp.float32)

    keys = list(jax.random.split(key, 4 + 6 * L))
    ki = iter(keys)

    word_emb = normal(next(ki), (cfg.vocab_size, H))
    pos_emb = normal(next(ki), (cfg.max_position, H))
    type_emb = normal(next(ki), (cfg.type_vocab, H))

    params = {
        "word_emb": word_emb,
        # position + token-type(=0) embedding, pre-summed (both are per-position constants)
        "pos_type": pos_emb + type_emb[0][None, :],
        "emb_ln_g": jnp.ones((1, H), jnp.float32),
        "emb_ln_b": jnp.zeros((1, H), jnp.float32),
        # pooler: re-initialized in _do_reinit (normal weight, zero bias)
        "pooler_w": normal(next(ki), (H, H)),
        "pooler_b": jnp.zeros((1, H), jnp.float32),
    }

    wqkv, wo, wi, wf = [], [], [], []
    for _ in range(L):
        wq = normal(next(ki), (H, H)) * scale     # attention scale folded into Wq
        wk = normal(next(ki), (H, H))
        wv = normal(next(ki), (H, H))
        wqkv.append(jnp.concatenate([wq, wk, wv], axis=1))   # fused [H, 3H]
        wo.append(normal(next(ki), (H, H)))
        wi.append(normal(next(ki), (H, I)))
        wf.append(normal(next(ki), (I, H)))

    params.update({
        "wqkv": jnp.stack(wqkv),                  # [L, H, 3H]
        "bqkv": jnp.zeros((L, 1, 3 * H), jnp.float32),
        "wo": jnp.stack(wo), "bo": jnp.zeros((L, 1, H), jnp.float32),
        "ln1_g": jnp.ones((L, 1, H), jnp.float32), "ln1_b": jnp.zeros((L, 1, H), jnp.float32),
        "wi": jnp.stack(wi), "bi": jnp.zeros((L, 1, I), jnp.float32),
        "wf": jnp.stack(wf), "bf": jnp.zeros((L, 1, H), jnp.float32),
        "ln2_g": jnp.ones((L, 1, H), jnp.float32), "ln2_b": jnp.zeros((L, 1, H), jnp.float32),
    })
    return params


# ----------------------------- forward -----------------------------

def bert_forward(params, input_ids, attention_mask, cfg):
    B, S = input_ids.shape
    H, Hh, L, I, V = (cfg.hidden_size, cfg.num_heads, cfg.num_layers,
                      cfg.intermediate_size, cfg.vocab_size)
    Dh = H // Hh
    BS = B * S

    ids = input_ids.reshape(BS, 1).astype(jnp.int32)
    mask = attention_mask.astype(jnp.int32)

    kern = functools.partial(
        _fused_bert_kernel, L=L, B=B, S=S, H=H, Hh=Hh, Dh=Dh, I=I, V=V,
        eps=cfg.layer_norm_eps)

    args = (ids, mask,
            params["word_emb"], params["pos_type"],
            params["emb_ln_g"], params["emb_ln_b"],
            params["wqkv"], params["bqkv"], params["wo"], params["bo"],
            params["ln1_g"], params["ln1_b"],
            params["wi"], params["bi"], params["wf"], params["bf"],
            params["ln2_g"], params["ln2_b"],
            params["pooler_w"], params["pooler_b"])

    out_shapes = (jax.ShapeDtypeStruct((BS, H), jnp.float32),
                  jax.ShapeDtypeStruct((B, H), jnp.float32))

    # advisory cost estimate so XLA schedules neighbours around this tiny fused kernel
    nbh = B * Hh
    flops = (2 * BS * V * H
             + L * (2 * BS * H * 3 * H + 4 * nbh * S * S * Dh
                    + 2 * BS * H * H + 4 * BS * H * I)
             + 2 * B * BS * H + 2 * B * H * H)
    transcendentals = L * (nbh * S * S + BS * I) + B * H + (2 * L + 1) * BS
    bytes_accessed = (sum(int(a.size) * a.dtype.itemsize for a in args)
                      + (BS * H + B * H) * 4)

    vmem_spec = pl.BlockSpec(memory_space=pltpu.MemorySpace.VMEM)
    last, pooled = pl.pallas_call(
        kern,
        out_shape=out_shapes,
        in_specs=[vmem_spec] * len(args),
        out_specs=(vmem_spec, vmem_spec),
        cost_estimate=pl.CostEstimate(flops=int(flops),
                                      transcendentals=int(transcendentals),
                                      bytes_accessed=int(bytes_accessed)),
        # gridless: the whole model is VMEM-resident for one invocation.
        # TODO(synk): at larger B/S, add a batch grid axis with
        # dimension_semantics=("parallel",) to use both v7x TensorCores.
    )(*args)

    return last.reshape(B, S, H), pooled


# ----------------------------- pure-JAX reference (correctness check) -----------------------------

def bert_forward_ref(params, input_ids, attention_mask, cfg):
    B, S = input_ids.shape
    H, Hh, L = cfg.hidden_size, cfg.num_heads, cfg.num_layers
    Dh = H // Hh
    eps = cfg.layer_norm_eps

    def ln(x, g, b):
        mu = jnp.mean(x, -1, keepdims=True)
        var = jnp.mean((x - mu) ** 2, -1, keepdims=True)
        return (x - mu) * jax.lax.rsqrt(var + eps) * g + b

    emb = (jnp.take(params["word_emb"], input_ids, axis=0)
           + params["pos_type"][:S][None, :, :]).reshape(B * S, H)
    h = ln(emb, params["emb_ln_g"], params["emb_ln_b"])
    add_mask = (1.0 - attention_mask.astype(jnp.float32)) * -1e9         # [B, S]

    for l in range(L):
        qkv = h @ params["wqkv"][l] + params["bqkv"][l]                  # [B*S, 3H]
        q, k, v = jnp.split(qkv, 3, axis=1)

        def sh(x):
            return x.reshape(B, S, Hh, Dh).transpose(0, 2, 1, 3)
        q, k, v = sh(q), sh(k), sh(v)
        # NOTE: 1/sqrt(Dh) is folded into Wq at init, so no extra scale here.
        s = jnp.einsum("bhqd,bhkd->bhqk", q, k) + add_mask[:, None, None, :]
        p = jax.nn.softmax(s, axis=-1)
        ctx = jnp.einsum("bhqk,bhkd->bhqd", p, v).transpose(0, 2, 1, 3).reshape(B * S, H)
        h = ln(h + ctx @ params["wo"][l] + params["bo"][l],
               params["ln1_g"][l], params["ln1_b"][l])
        inter = jax.nn.gelu(h @ params["wi"][l] + params["bi"][l], approximate=True)
        h = ln(h + inter @ params["wf"][l] + params["bf"][l],
               params["ln2_g"][l], params["ln2_b"][l])

    last = h.reshape(B, S, H)
    cls = last[:, 0, :]
    pooled = jnp.tanh(cls @ params["pooler_w"] + params["pooler_b"])
    return last, pooled


# ----------------------------- main -----------------------------

if __name__ == "__main__":
    cfg = Config()
    B, S = 2, 8

    key = jax.random.PRNGKey(0)
    k_param, k_ids = jax.random.split(key)
    params = init_params(k_param, cfg, reinit_n_layers=1)

    input_ids = jax.random.randint(k_ids, (B, S), 0, cfg.vocab_size, dtype=jnp.int32)
    attention_mask = jnp.ones((B, S), dtype=jnp.int32).at[1, 6:].set(0)   # padded tail

    fwd = jax.jit(functools.partial(bert_forward, cfg=cfg))
    last_hidden, pooled = fwd(params, input_ids, attention_mask)
    jax.block_until_ready((last_hidden, pooled))

    # reference check (tolerance covers approx reciprocal in the softmax)
    ref_last, ref_pooled = bert_forward_ref(params, input_ids, attention_mask, cfg)
    assert last_hidden.shape == (B, S, cfg.hidden_size)
    assert pooled.shape == (B, cfg.hidden_size)
    assert jnp.all(jnp.isfinite(last_hidden)) and jnp.all(jnp.isfinite(pooled))
    assert jnp.allclose(last_hidden, ref_last, atol=1e-2, rtol=1e-2)
    assert jnp.allclose(pooled, ref_pooled, atol=1e-2, rtol=1e-2)
    print("KERNEL_OK")
</pallas_src>

<mosaic_0001>
module attributes {stable_mosaic.version = 11 : i64} {
  func.func @_fused_bert_kernel(%arg0: memref<16x1xi32, #tpu.memory_space<vmem>>, %arg1: memref<2x8xi32, #tpu.memory_space<vmem>>, %arg2: memref<100x32xf32, #tpu.memory_space<vmem>>, %arg3: memref<16x32xf32, #tpu.memory_space<vmem>>, %arg4: memref<1x32xf32, #tpu.memory_space<vmem>>, %arg5: memref<1x32xf32, #tpu.memory_space<vmem>>, %arg6: memref<2x32x96xf32, #tpu.memory_space<vmem>>, %arg7: memref<2x1x96xf32, #tpu.memory_space<vmem>>, %arg8: memref<2x32x32xf32, #tpu.memory_space<vmem>>, %arg9: memref<2x1x32xf32, #tpu.memory_space<vmem>>, %arg10: memref<2x1x32xf32, #tpu.memory_space<vmem>>, %arg11: memref<2x1x32xf32, #tpu.memory_space<vmem>>, %arg12: memref<2x32x64xf32, #tpu.memory_space<vmem>>, %arg13: memref<2x1x64xf32, #tpu.memory_space<vmem>>, %arg14: memref<2x64x32xf32, #tpu.memory_space<vmem>>, %arg15: memref<2x1x32xf32, #tpu.memory_space<vmem>>, %arg16: memref<2x1x32xf32, #tpu.memory_space<vmem>>, %arg17: memref<2x1x32xf32, #tpu.memory_space<vmem>>, %arg18: memref<32x32xf32, #tpu.memory_space<vmem>>, %arg19: memref<1x32xf32, #tpu.memory_space<vmem>>, %arg20: memref<16x32xf32, #tpu.memory_space<vmem>>, %arg21: memref<2x32xf32, #tpu.memory_space<vmem>>) attributes {dimension_semantics = [], scalar_prefetch = 0 : i64, scratch_operands = 0 : i64, tpu.core_type = #tpu.core_type<tc>} {
    %c0 = arith.constant 0 : index
    %c0_0 = arith.constant 0 : index
    %0 = vector.load %arg0[%c0, %c0_0] : memref<16x1xi32, #tpu.memory_space<vmem>>, vector<16x1xi32>
    %1 = tpu.iota {dimensions = array<i32: 1>} : vector<16x100xi32>
    %2 = vector.broadcast %0 : vector<16x1xi32> to vector<16x100xi32>
    %3 = arith.cmpi eq, %1, %2 : vector<16x100xi32>
    %4 = arith.extui %3 : vector<16x100xi1> to vector<16x100xi32>
    %5 = arith.sitofp %4 : vector<16x100xi32> to vector<16x100xf32>
    %c0_1 = arith.constant 0 : index
    %c0_2 = arith.constant 0 : index
    %6 = vector.load %arg2[%c0_1, %c0_2] : memref<100x32xf32, #tpu.memory_space<vmem>>, vector<100x32xf32>
    %cst = arith.constant dense<0.000000e+00> : vector<16x32xf32>
    %7 = tpu.matmul %5, %6, %cst {dimension_numbers = #tpu.dot_dimension_numbers<[1], [0], [0], [1], [0, 0, 1, 1], [], []>} : vector<16x100xf32>, vector<100x32xf32>, vector<16x32xf32> -> vector<16x32xf32>
    %c0_3 = arith.constant 0 : index
    %c0_4 = arith.constant 0 : index
    %8 = vector.load %arg3[%c0_3, %c0_4] : memref<16x32xf32, #tpu.memory_space<vmem>>, vector<8x32xf32>
    %9 = tpu.concatenate %8, %8 in 0 : vector<8x32xf32>, vector<8x32xf32> -> vector<16x32xf32>
    %10 = arith.addf %7, %9 : vector<16x32xf32>
    %c0_5 = arith.constant 0 : index
    %c0_6 = arith.constant 0 : index
    %11 = vector.load %arg4[%c0_5, %c0_6] : memref<1x32xf32, #tpu.memory_space<vmem>>, vector<1x32xf32>
    %c0_7 = arith.constant 0 : index
    %c0_8 = arith.constant 0 : index
    %12 = vector.load %arg5[%c0_7, %c0_8] : memref<1x32xf32, #tpu.memory_space<vmem>>, vector<1x32xf32>
    %cst_9 = arith.constant dense<0.000000e+00> : vector<16xf32>
    %13 = vector.multi_reduction <add>, %10, %cst_9 [1] : vector<16x32xf32> to vector<16xf32>
    %14 = vector.shape_cast %13 : vector<16xf32> to vector<16x1xf32>
    %cst_10 = arith.constant 3.200000e+01 : f32
    %15 = vector.broadcast %cst_10 : f32 to vector<16x1xf32>
    %16 = arith.divf %14, %15 : vector<16x1xf32>
    %17 = vector.broadcast %16 : vector<16x1xf32> to vector<16x32xf32>
    %18 = arith.subf %10, %17 : vector<16x32xf32>
    %19 = arith.mulf %18, %18 : vector<16x32xf32>
    %cst_11 = arith.constant dense<0.000000e+00> : vector<16xf32>
    %20 = vector.multi_reduction <add>, %19, %cst_11 [1] : vector<16x32xf32> to vector<16xf32>
    %21 = vector.shape_cast %20 : vector<16xf32> to vector<16x1xf32>
    %cst_12 = arith.constant 3.200000e+01 : f32
    %22 = vector.broadcast %cst_12 : f32 to vector<16x1xf32>
    %23 = arith.divf %21, %22 : vector<16x1xf32>
    %cst_13 = arith.constant 9.99999996E-13 : f32
    %24 = vector.broadcast %cst_13 : f32 to vector<16x1xf32>
    %25 = arith.addf %23, %24 : vector<16x1xf32>
    %26 = math.rsqrt %25 : vector<16x1xf32>
    %27 = vector.broadcast %26 : vector<16x1xf32> to vector<16x32xf32>
    %28 = arith.mulf %18, %27 : vector<16x32xf32>
    %29 = vector.broadcast %11 : vector<1x32xf32> to vector<16x32xf32>
    %30 = arith.mulf %28, %29 : vector<16x32xf32>
    %31 = vector.broadcast %12 : vector<1x32xf32> to vector<16x32xf32>
    %32 = arith.addf %30, %31 : vector<16x32xf32>
    %c0_14 = arith.constant 0 : index
    %c0_15 = arith.constant 0 : index
    %33 = vector.load %arg1[%c0_14, %c0_15] : memref<2x8xi32, #tpu.memory_space<vmem>>, vector<2x8xi32>
    %34 = arith.sitofp %33 : vector<2x8xi32> to vector<2x8xf32>
    %cst_16 = arith.constant 1.000000e+00 : f32
    %35 = vector.broadcast %cst_16 : f32 to vector<2x8xf32>
    %36 = arith.subf %35, %34 : vector<2x8xf32>
    %cst_17 = arith.constant -1.000000e+09 : f32
    %37 = vector.broadcast %cst_17 : f32 to vector<2x8xf32>
    %38 = arith.mulf %36, %37 : vector<2x8xf32>
    %39 = vector.shape_cast %38 : vector<2x8xf32> to vector<2x1x8xf32>
    %40 = vector.shape_cast %39 : vector<2x1x8xf32> to vector<2x1x8xf32>
    %41 = vector.broadcast %40 : vector<2x1x8xf32> to vector<2x8x8xf32>
    %42 = tpu.concatenate %41, %41 in 0 : vector<2x8x8xf32>, vector<2x8x8xf32> -> vector<4x8x8xf32>
    %c0_18 = arith.constant 0 : index
    %c0_19 = arith.constant 0 : index
    %c0_20 = arith.constant 0 : index
    %43 = vector.load %arg6[%c0_18, %c0_19, %c0_20] : memref<2x32x96xf32, #tpu.memory_space<vmem>>, vector<1x32x96xf32>
    %44 = vector.shape_cast %43 : vector<1x32x96xf32> to vector<32x96xf32>
    %cst_21 = arith.constant dense<0.000000e+00> : vector<16x96xf32>
    %45 = tpu.matmul %32, %44, %cst_21 {dimension_numbers = #tpu.dot_dimension_numbers<[1], [0], [0], [1], [0, 0, 1, 1], [], []>} : vector<16x32xf32>, vector<32x96xf32>, vector<16x96xf32> -> vector<16x96xf32>
    %c0_22 = arith.constant 0 : index
    %c0_23 = arith.constant 0 : index
    %c0_24 = arith.constant 0 : index
    %46 = vector.load %arg7[%c0_22, %c0_23, %c0_24] : memref<2x1x96xf32, #tpu.memory_space<vmem>>, vector<1x1x96xf32>
    %47 = vector.shape_cast %46 : vector<1x1x96xf32> to vector<1x96xf32>
    %48 = vector.broadcast %47 : vector<1x96xf32> to vector<16x96xf32>
    %49 = arith.addf %45, %48 : vector<16x96xf32>
    %50 = vector.shape_cast %49 : vector<16x96xf32> to vector<2x8x96xf32>
    %51 = vector.extract_strided_slice %50 {offsets = [0, 0, 0], sizes = [2, 8, 16], strides = [1, 1, 1]} : vector<2x8x96xf32> to vector<2x8x16xf32>
    %52 = vector.extract_strided_slice %50 {offsets = [0, 0, 16], sizes = [2, 8, 16], strides = [1, 1, 1]} : vector<2x8x96xf32> to vector<2x8x16xf32>
    %53 = tpu.concatenate %51, %52 in 0 : vector<2x8x16xf32>, vector<2x8x16xf32> -> vector<4x8x16xf32>
    %54 = vector.extract_strided_slice %50 {offsets = [0, 0, 32], sizes = [2, 8, 16], strides = [1, 1, 1]} : vector<2x8x96xf32> to vector<2x8x16xf32>
    %55 = vector.extract_strided_slice %50 {offsets = [0, 0, 48], sizes = [2, 8, 16], strides = [1, 1, 1]} : vector<2x8x96xf32> to vector<2x8x16xf32>
    %56 = tpu.concatenate %54, %55 in 0 : vector<2x8x16xf32>, vector<2x8x16xf32> -> vector<4x8x16xf32>
    %57 = vector.extract_strided_slice %50 {offsets = [0, 0, 64], sizes = [2, 8, 16], strides = [1, 1, 1]} : vector<2x8x96xf32> to vector<2x8x16xf32>
    %58 = vector.extract_strided_slice %50 {offsets = [0, 0, 80], sizes = [2, 8, 16], strides = [1, 1, 1]} : vector<2x8x96xf32> to vector<2x8x16xf32>
    %59 = tpu.concatenate %57, %58 in 0 : vector<2x8x16xf32>, vector<2x8x16xf32> -> vector<4x8x16xf32>
    "tpu.trace_start"() <{level = 10 : i32, message = "bqd,bkd->bqk"}> : () -> ()
    %cst_25 = arith.constant dense<0.000000e+00> : vector<4x8x8xf32>
    %60 = tpu.matmul %53, %56, %cst_25 {dimension_numbers = #tpu.dot_dimension_numbers<[2], [2], [1], [1], [0, 0, 0, 1, 1, 1], [0], [0]>} : vector<4x8x16xf32>, vector<4x8x16xf32>, vector<4x8x8xf32> -> vector<4x8x8xf32>
    "tpu.trace_stop"() : () -> ()
    %61 = arith.addf %60, %42 : vector<4x8x8xf32>
    %cst_26 = arith.constant dense<0xFF800000> : vector<4x8xf32>
    %62 = vector.multi_reduction <maximumf>, %61, %cst_26 [2] : vector<4x8x8xf32> to vector<4x8xf32>
    %63 = vector.shape_cast %62 : vector<4x8xf32> to vector<4x8x1xf32>
    %64 = vector.broadcast %63 : vector<4x8x1xf32> to vector<4x8x8xf32>
    %65 = arith.subf %61, %64 : vector<4x8x8xf32>
    %66 = math.exp %65 : vector<4x8x8xf32>
    %cst_27 = arith.constant dense<0.000000e+00> : vector<4x8xf32>
    %67 = vector.multi_reduction <add>, %66, %cst_27 [2] : vector<4x8x8xf32> to vector<4x8xf32>
    %68 = vector.shape_cast %67 : vector<4x8xf32> to vector<4x8x1xf32>
    %69 = tpu.reciprocal %68 {approx = true} : vector<4x8x1xf32> -> vector<4x8x1xf32>
    %70 = vector.broadcast %69 : vector<4x8x1xf32> to vector<4x8x8xf32>
    %71 = arith.mulf %66, %70 : vector<4x8x8xf32>
    "tpu.trace_start"() <{level = 10 : i32, message = "bqk,bkd->bqd"}> : () -> ()
    %cst_28 = arith.constant dense<0.000000e+00> : vector<4x8x16xf32>
    %72 = tpu.matmul %71, %59, %cst_28 {dimension_numbers = #tpu.dot_dimension_numbers<[2], [1], [1], [2], [0, 0, 0, 1, 1, 2], [0], [0]>} : vector<4x8x8xf32>, vector<4x8x16xf32>, vector<4x8x16xf32> -> vector<4x8x16xf32>
    "tpu.trace_stop"() : () -> ()
    %73 = vector.extract_strided_slice %72 {offsets = [0, 0, 0], sizes = [2, 8, 16], strides = [1, 1, 1]} : vector<4x8x16xf32> to vector<2x8x16xf32>
    %74 = vector.shape_cast %73 : vector<2x8x16xf32> to vector<16x16xf32>
    %75 = vector.extract_strided_slice %72 {offsets = [2, 0, 0], sizes = [2, 8, 16], strides = [1, 1, 1]} : vector<4x8x16xf32> to vector<2x8x16xf32>
    %76 = vector.shape_cast %75 : vector<2x8x16xf32> to vector<16x16xf32>
    %77 = tpu.concatenate %74, %76 in 1 : vector<16x16xf32>, vector<16x16xf32> -> vector<16x32xf32>
    %c0_29 = arith.constant 0 : index
    %c0_30 = arith.constant 0 : index
    %c0_31 = arith.constant 0 : index
    %78 = vector.load %arg8[%c0_29, %c0_30, %c0_31] : memref<2x32x32xf32, #tpu.memory_space<vmem>>, vector<1x32x32xf32>
    %79 = vector.shape_cast %78 : vector<1x32x32xf32> to vector<32x32xf32>
    %cst_32 = arith.constant dense<0.000000e+00> : vector<16x32xf32>
    %80 = tpu.matmul %77, %79, %cst_32 {dimension_numbers = #tpu.dot_dimension_numbers<[1], [0], [0], [1], [0, 0, 1, 1], [], []>} : vector<16x32xf32>, vector<32x32xf32>, vector<16x32xf32> -> vector<16x32xf32>
    %c0_33 = arith.constant 0 : index
    %c0_34 = arith.constant 0 : index
    %c0_35 = arith.constant 0 : index
    %81 = vector.load %arg9[%c0_33, %c0_34, %c0_35] : memref<2x1x32xf32, #tpu.memory_space<vmem>>, vector<1x1x32xf32>
    %82 = vector.shape_cast %81 : vector<1x1x32xf32> to vector<1x32xf32>
    %83 = vector.broadcast %82 : vector<1x32xf32> to vector<16x32xf32>
    %84 = arith.addf %80, %83 : vector<16x32xf32>
    %85 = arith.addf %32, %84 : vector<16x32xf32>
    %c0_36 = arith.constant 0 : index
    %c0_37 = arith.constant 0 : index
    %c0_38 = arith.constant 0 : index
    %86 = vector.load %arg10[%c0_36, %c0_37, %c0_38] : memref<2x1x32xf32, #tpu.memory_space<vmem>>, vector<1x1x32xf32>
    %87 = vector.shape_cast %86 : vector<1x1x32xf32> to vector<1x32xf32>
    %c0_39 = arith.constant 0 : index
    %c0_40 = arith.constant 0 : index
    %c0_41 = arith.constant 0 : index
    %88 = vector.load %arg11[%c0_39, %c0_40, %c0_41] : memref<2x1x32xf32, #tpu.memory_space<vmem>>, vector<1x1x32xf32>
    %89 = vector.shape_cast %88 : vector<1x1x32xf32> to vector<1x32xf32>
    %cst_42 = arith.constant dense<0.000000e+00> : vector<16xf32>
    %90 = vector.multi_reduction <add>, %85, %cst_42 [1] : vector<16x32xf32> to vector<16xf32>
    %91 = vector.shape_cast %90 : vector<16xf32> to vector<16x1xf32>
    %cst_43 = arith.constant 3.200000e+01 : f32
    %92 = vector.broadcast %cst_43 : f32 to vector<16x1xf32>
    %93 = arith.divf %91, %92 : vector<16x1xf32>
    %94 = vector.broadcast %93 : vector<16x1xf32> to vector<16x32xf32>
    %95 = arith.subf %85, %94 : vector<16x32xf32>
    %96 = arith.mulf %95, %95 : vector<16x32xf32>
    %cst_44 = arith.constant dense<0.000000e+00> : vector<16xf32>
    %97 = vector.multi_reduction <add>, %96, %cst_44 [1] : vector<16x32xf32> to vector<16xf32>
    %98 = vector.shape_cast %97 : vector<16xf32> to vector<16x1xf32>
    %cst_45 = arith.constant 3.200000e+01 : f32
    %99 = vector.broadcast %cst_45 : f32 to vector<16x1xf32>
    %100 = arith.divf %98, %99 : vector<16x1xf32>
    %cst_46 = arith.constant 9.99999996E-13 : f32
    %101 = vector.broadcast %cst_46 : f32 to vector<16x1xf32>
    %102 = arith.addf %100, %101 : vector<16x1xf32>
    %103 = math.rsqrt %102 : vector<16x1xf32>
    %104 = vector.broadcast %103 : vector<16x1xf32> to vector<16x32xf32>
    %105 = arith.mulf %95, %104 : vector<16x32xf32>
    %106 = vector.broadcast %87 : vector<1x32xf32> to vector<16x32xf32>
    %107 = arith.mulf %105, %106 : vector<16x32xf32>
    %108 = vector.broadcast %89 : vector<1x32xf32> to vector<16x32xf32>
    %109 = arith.addf %107, %108 : vector<16x32xf32>
    %c0_47 = arith.constant 0 : index
    %c0_48 = arith.constant 0 : index
    %c0_49 = arith.constant 0 : index
    %110 = vector.load %arg12[%c0_47, %c0_48, %c0_49] : memref<2x32x64xf32, #tpu.memory_space<vmem>>, vector<1x32x64xf32>
    %111 = vector.shape_cast %110 : vector<1x32x64xf32> to vector<32x64xf32>
    %cst_50 = arith.constant dense<0.000000e+00> : vector<16x64xf32>
    %112 = tpu.matmul %109, %111, %cst_50 {dimension_numbers = #tpu.dot_dimension_numbers<[1], [0], [0], [1], [0, 0, 1, 1], [], []>} : vector<16x32xf32>, vector<32x64xf32>, vector<16x64xf32> -> vector<16x64xf32>
    %c0_51 = arith.constant 0 : index
    %c0_52 = arith.constant 0 : index
    %c0_53 = arith.constant 0 : index
    %113 = vector.load %arg13[%c0_51, %c0_52, %c0_53] : memref<2x1x64xf32, #tpu.memory_space<vmem>>, vector<1x1x64xf32>
    %114 = vector.shape_cast %113 : vector<1x1x64xf32> to vector<1x64xf32>
    %115 = vector.broadcast %114 : vector<1x64xf32> to vector<16x64xf32>
    %116 = arith.addf %112, %115 : vector<16x64xf32>
    %117 = arith.mulf %116, %116 : vector<16x64xf32>
    %118 = arith.mulf %116, %117 : vector<16x64xf32>
    %cst_54 = arith.constant 4.471500e-02 : f32
    %119 = vector.broadcast %cst_54 : f32 to vector<16x64xf32>
    %120 = arith.mulf %119, %118 : vector<16x64xf32>
    %121 = arith.addf %116, %120 : vector<16x64xf32>
    %cst_55 = arith.constant 0.797884583 : f32
    %122 = vector.broadcast %cst_55 : f32 to vector<16x64xf32>
    %123 = arith.mulf %122, %121 : vector<16x64xf32>
    %124 = math.tanh %123 : vector<16x64xf32>
    %cst_56 = arith.constant 1.000000e+00 : f32
    %125 = vector.broadcast %cst_56 : f32 to vector<16x64xf32>
    %126 = arith.addf %125, %124 : vector<16x64xf32>
    %cst_57 = arith.constant 5.000000e-01 : f32
    %127 = vector.broadcast %cst_57 : f32 to vector<16x64xf32>
    %128 = arith.mulf %127, %126 : vector<16x64xf32>
    %129 = arith.mulf %116, %128 : vector<16x64xf32>
    %c0_58 = arith.constant 0 : index
    %c0_59 = arith.constant 0 : index
    %c0_60 = arith.constant 0 : index
    %130 = vector.load %arg14[%c0_58, %c0_59, %c0_60] : memref<2x64x32xf32, #tpu.memory_space<vmem>>, vector<1x64x32xf32>
    %131 = vector.shape_cast %130 : vector<1x64x32xf32> to vector<64x32xf32>
    %cst_61 = arith.constant dense<0.000000e+00> : vector<16x32xf32>
    %132 = tpu.matmul %129, %131, %cst_61 {dimension_numbers = #tpu.dot_dimension_numbers<[1], [0], [0], [1], [0, 0, 1, 1], [], []>} : vector<16x64xf32>, vector<64x32xf32>, vector<16x32xf32> -> vector<16x32xf32>
    %c0_62 = arith.constant 0 : index
    %c0_63 = arith.constant 0 : index
    %c0_64 = arith.constant 0 : index
    %133 = vector.load %arg15[%c0_62, %c0_63, %c0_64] : memref<2x1x32xf32, #tpu.memory_space<vmem>>, vector<1x1x32xf32>
    %134 = vector.shape_cast %133 : vector<1x1x32xf32> to vector<1x32xf32>
    %135 = vector.broadcast %134 : vector<1x32xf32> to vector<16x32xf32>
    %136 = arith.addf %132, %135 : vector<16x32xf32>
    %137 = arith.addf %109, %136 : vector<16x32xf32>
    %c0_65 = arith.constant 0 : index
    %c0_66 = arith.constant 0 : index
    %c0_67 = arith.constant 0 : index
    %138 = vector.load %arg16[%c0_65, %c0_66, %c0_67] : memref<2x1x32xf32, #tpu.memory_space<vmem>>, vector<1x1x32xf32>
    %139 = vector.shape_cast %138 : vector<1x1x32xf32> to vector<1x32xf32>
    %c0_68 = arith.constant 0 : index
    %c0_69 = arith.constant 0 : index
    %c0_70 = arith.constant 0 : index
    %140 = vector.load %arg17[%c0_68, %c0_69, %c0_70] : memref<2x1x32xf32, #tpu.memory_space<vmem>>, vector<1x1x32xf32>
    %141 = vector.shape_cast %140 : vector<1x1x32xf32> to vector<1x32xf32>
    %cst_71 = arith.constant dense<0.000000e+00> : vector<16xf32>
    %142 = vector.multi_reduction <add>, %137, %cst_71 [1] : vector<16x32xf32> to vector<16xf32>
    %143 = vector.shape_cast %142 : vector<16xf32> to vector<16x1xf32>
    %cst_72 = arith.constant 3.200000e+01 : f32
    %144 = vector.broadcast %cst_72 : f32 to vector<16x1xf32>
    %145 = arith.divf %143, %144 : vector<16x1xf32>
    %146 = vector.broadcast %145 : vector<16x1xf32> to vector<16x32xf32>
    %147 = arith.subf %137, %146 : vector<16x32xf32>
    %148 = arith.mulf %147, %147 : vector<16x32xf32>
    %cst_73 = arith.constant dense<0.000000e+00> : vector<16xf32>
    %149 = vector.multi_reduction <add>, %148, %cst_73 [1] : vector<16x32xf32> to vector<16xf32>
    %150 = vector.shape_cast %149 : vector<16xf32> to vector<16x1xf32>
    %cst_74 = arith.constant 3.200000e+01 : f32
    %151 = vector.broadcast %cst_74 : f32 to vector<16x1xf32>
    %152 = arith.divf %150, %151 : vector<16x1xf32>
    %cst_75 = arith.constant 9.99999996E-13 : f32
    %153 = vector.broadcast %cst_75 : f32 to vector<16x1xf32>
    %154 = arith.addf %152, %153 : vector<16x1xf32>
    %155 = math.rsqrt %154 : vector<16x1xf32>
    %156 = vector.broadcast %155 : vector<16x1xf32> to vector<16x32xf32>
    %157 = arith.mulf %147, %156 : vector<16x32xf32>
    %158 = vector.broadcast %139 : vector<1x32xf32> to vector<16x32xf32>
    %159 = arith.mulf %157, %158 : vector<16x32xf32>
    %160 = vector.broadcast %141 : vector<1x32xf32> to vector<16x32xf32>
    %161 = arith.addf %159, %160 : vector<16x32xf32>
    %c1 = arith.constant 1 : index
    %c0_76 = arith.constant 0 : index
    %c0_77 = arith.constant 0 : index
    %162 = vector.load %arg6[%c1, %c0_76, %c0_77] : memref<2x32x96xf32, #tpu.memory_space<vmem>>, vector<1x32x96xf32>
    %163 = vector.shape_cast %162 : vector<1x32x96xf32> to vector<32x96xf32>
    %cst_78 = arith.constant dense<0.000000e+00> : vector<16x96xf32>
    %164 = tpu.matmul %161, %163, %cst_78 {dimension_numbers = #tpu.dot_dimension_numbers<[1], [0], [0], [1], [0, 0, 1, 1], [], []>} : vector<16x32xf32>, vector<32x96xf32>, vector<16x96xf32> -> vector<16x96xf32>
    %c1_79 = arith.constant 1 : index
    %c0_80 = arith.constant 0 : index
    %c0_81 = arith.constant 0 : index
    %165 = vector.load %arg7[%c1_79, %c0_80, %c0_81] : memref<2x1x96xf32, #tpu.memory_space<vmem>>, vector<1x1x96xf32>
    %166 = vector.shape_cast %165 : vector<1x1x96xf32> to vector<1x96xf32>
    %167 = vector.broadcast %166 : vector<1x96xf32> to vector<16x96xf32>
    %168 = arith.addf %164, %167 : vector<16x96xf32>
    %169 = vector.shape_cast %168 : vector<16x96xf32> to vector<2x8x96xf32>
    %170 = vector.extract_strided_slice %169 {offsets = [0, 0, 0], sizes = [2, 8, 16], strides = [1, 1, 1]} : vector<2x8x96xf32> to vector<2x8x16xf32>
    %171 = vector.extract_strided_slice %169 {offsets = [0, 0, 16], sizes = [2, 8, 16], strides = [1, 1, 1]} : vector<2x8x96xf32> to vector<2x8x16xf32>
    %172 = tpu.concatenate %170, %171 in 0 : vector<2x8x16xf32>, vector<2x8x16xf32> -> vector<4x8x16xf32>
    %173 = vector.extract_strided_slice %169 {offsets = [0, 0, 32], sizes = [2, 8, 16], strides = [1, 1, 1]} : vector<2x8x96xf32> to vector<2x8x16xf32>
    %174 = vector.extract_strided_slice %169 {offsets = [0, 0, 48], sizes = [2, 8, 16], strides = [1, 1, 1]} : vector<2x8x96xf32> to vector<2x8x16xf32>
    %175 = tpu.concatenate %173, %174 in 0 : vector<2x8x16xf32>, vector<2x8x16xf32> -> vector<4x8x16xf32>
    %176 = vector.extract_strided_slice %169 {offsets = [0, 0, 64], sizes = [2, 8, 16], strides = [1, 1, 1]} : vector<2x8x96xf32> to vector<2x8x16xf32>
    %177 = vector.extract_strided_slice %169 {offsets = [0, 0, 80], sizes = [2, 8, 16], strides = [1, 1, 1]} : vector<2x8x96xf32> to vector<2x8x16xf32>
    %178 = tpu.concatenate %176, %177 in 0 : vector<2x8x16xf32>, vector<2x8x16xf32> -> vector<4x8x16xf32>
    "tpu.trace_start"() <{level = 10 : i32, message = "bqd,bkd->bqk"}> : () -> ()
    %cst_82 = arith.constant dense<0.000000e+00> : vector<4x8x8xf32>
    %179 = tpu.matmul %172, %175, %cst_82 {dimension_numbers = #tpu.dot_dimension_numbers<[2], [2], [1], [1], [0, 0, 0, 1, 1, 1], [0], [0]>} : vector<4x8x16xf32>, vector<4x8x16xf32>, vector<4x8x8xf32> -> vector<4x8x8xf32>
    "tpu.trace_stop"() : () -> ()
    %180 = arith.addf %179, %42 : vector<4x8x8xf32>
    %cst_83 = arith.constant dense<0xFF800000> : vector<4x8xf32>
    %181 = vector.multi_reduction <maximumf>, %180, %cst_83 [2] : vector<4x8x8xf32> to vector<4x8xf32>
    %182 = vector.shape_cast %181 : vector<4x8xf32> to vector<4x8x1xf32>
    %183 = vector.broadcast %182 : vector<4x8x1xf32> to vector<4x8x8xf32>
    %184 = arith.subf %180, %183 : vector<4x8x8xf32>
    %185 = math.exp %184 : vector<4x8x8xf32>
    %cst_84 = arith.constant dense<0.000000e+00> : vector<4x8xf32>
    %186 = vector.multi_reduction <add>, %185, %cst_84 [2] : vector<4x8x8xf32> to vector<4x8xf32>
    %187 = vector.shape_cast %186 : vector<4x8xf32> to vector<4x8x1xf32>
    %188 = tpu.reciprocal %187 {approx = true} : vector<4x8x1xf32> -> vector<4x8x1xf32>
    %189 = vector.broadcast %188 : vector<4x8x1xf32> to vector<4x8x8xf32>
    %190 = arith.mulf %185, %189 : vector<4x8x8xf32>
    "tpu.trace_start"() <{level = 10 : i32, message = "bqk,bkd->bqd"}> : () -> ()
    %cst_85 = arith.constant dense<0.000000e+00> : vector<4x8x16xf32>
    %191 = tpu.matmul %190, %178, %cst_85 {dimension_numbers = #tpu.dot_dimension_numbers<[2], [1], [1], [2], [0, 0, 0, 1, 1, 2], [0], [0]>} : vector<4x8x8xf32>, vector<4x8x16xf32>, vector<4x8x16xf32> -> vector<4x8x16xf32>
    "tpu.trace_stop"() : () -> ()
    %192 = vector.extract_strided_slice %191 {offsets = [0, 0, 0], sizes = [2, 8, 16], strides = [1, 1, 1]} : vector<4x8x16xf32> to vector<2x8x16xf32>
    %193 = vector.shape_cast %192 : vector<2x8x16xf32> to vector<16x16xf32>
    %194 = vector.extract_strided_slice %191 {offsets = [2, 0, 0], sizes = [2, 8, 16], strides = [1, 1, 1]} : vector<4x8x16xf32> to vector<2x8x16xf32>
    %195 = vector.shape_cast %194 : vector<2x8x16xf32> to vector<16x16xf32>
    %196 = tpu.concatenate %193, %195 in 1 : vector<16x16xf32>, vector<16x16xf32> -> vector<16x32xf32>
    %c1_86 = arith.constant 1 : index
    %c0_87 = arith.constant 0 : index
    %c0_88 = arith.constant 0 : index
    %197 = vector.load %arg8[%c1_86, %c0_87, %c0_88] : memref<2x32x32xf32, #tpu.memory_space<vmem>>, vector<1x32x32xf32>
    %198 = vector.shape_cast %197 : vector<1x32x32xf32> to vector<32x32xf32>
    %cst_89 = arith.constant dense<0.000000e+00> : vector<16x32xf32>
    %199 = tpu.matmul %196, %198, %cst_89 {dimension_numbers = #tpu.dot_dimension_numbers<[1], [0], [0], [1], [0, 0, 1, 1], [], []>} : vector<16x32xf32>, vector<32x32xf32>, vector<16x32xf32> -> vector<16x32xf32>
    %c1_90 = arith.constant 1 : index
    %c0_91 = arith.constant 0 : index
    %c0_92 = arith.constant 0 : index
    %200 = vector.load %arg9[%c1_90, %c0_91, %c0_92] : memref<2x1x32xf32, #tpu.memory_space<vmem>>, vector<1x1x32xf32>
    %201 = vector.shape_cast %200 : vector<1x1x32xf32> to vector<1x32xf32>
    %202 = vector.broadcast %201 : vector<1x32xf32> to vector<16x32xf32>
    %203 = arith.addf %199, %202 : vector<16x32xf32>
    %204 = arith.addf %161, %203 : vector<16x32xf32>
    %c1_93 = arith.constant 1 : index
    %c0_94 = arith.constant 0 : index
    %c0_95 = arith.constant 0 : index
    %205 = vector.load %arg10[%c1_93, %c0_94, %c0_95] : memref<2x1x32xf32, #tpu.memory_space<vmem>>, vector<1x1x32xf32>
    %206 = vector.shape_cast %205 : vector<1x1x32xf32> to vector<1x32xf32>
    %c1_96 = arith.constant 1 : index
    %c0_97 = arith.constant 0 : index
    %c0_98 = arith.constant 0 : index
    %207 = vector.load %arg11[%c1_96, %c0_97, %c0_98] : memref<2x1x32xf32, #tpu.memory_space<vmem>>, vector<1x1x32xf32>
    %208 = vector.shape_cast %207 : vector<1x1x32xf32> to vector<1x32xf32>
    %cst_99 = arith.constant dense<0.000000e+00> : vector<16xf32>
    %209 = vector.multi_reduction <add>, %204, %cst_99 [1] : vector<16x32xf32> to vector<16xf32>
    %210 = vector.shape_cast %209 : vector<16xf32> to vector<16x1xf32>
    %cst_100 = arith.constant 3.200000e+01 : f32
    %211 = vector.broadcast %cst_100 : f32 to vector<16x1xf32>
    %212 = arith.divf %210, %211 : vector<16x1xf32>
    %213 = vector.broadcast %212 : vector<16x1xf32> to vector<16x32xf32>
    %214 = arith.subf %204, %213 : vector<16x32xf32>
    %215 = arith.mulf %214, %214 : vector<16x32xf32>
    %cst_101 = arith.constant dense<0.000000e+00> : vector<16xf32>
    %216 = vector.multi_reduction <add>, %215, %cst_101 [1] : vector<16x32xf32> to vector<16xf32>
    %217 = vector.shape_cast %216 : vector<16xf32> to vector<16x1xf32>
    %cst_102 = arith.constant 3.200000e+01 : f32
    %218 = vector.broadcast %cst_102 : f32 to vector<16x1xf32>
    %219 = arith.divf %217, %218 : vector<16x1xf32>
    %cst_103 = arith.constant 9.99999996E-13 : f32
    %220 = vector.broadcast %cst_103 : f32 to vector<16x1xf32>
    %221 = arith.addf %219, %220 : vector<16x1xf32>
    %222 = math.rsqrt %221 : vector<16x1xf32>
    %223 = vector.broadcast %222 : vector<16x1xf32> to vector<16x32xf32>
    %224 = arith.mulf %214, %223 : vector<16x32xf32>
    %225 = vector.broadcast %206 : vector<1x32xf32> to vector<16x32xf32>
    %226 = arith.mulf %224, %225 : vector<16x32xf32>
    %227 = vector.broadcast %208 : vector<1x32xf32> to vector<16x32xf32>
    %228 = arith.addf %226, %227 : vector<16x32xf32>
    %c1_104 = arith.constant 1 : index
    %c0_105 = arith.constant 0 : index
    %c0_106 = arith.constant 0 : index
    %229 = vector.load %arg12[%c1_104, %c0_105, %c0_106] : memref<2x32x64xf32, #tpu.memory_space<vmem>>, vector<1x32x64xf32>
    %230 = vector.shape_cast %229 : vector<1x32x64xf32> to vector<32x64xf32>
    %cst_107 = arith.constant dense<0.000000e+00> : vector<16x64xf32>
    %231 = tpu.matmul %228, %230, %cst_107 {dimension_numbers = #tpu.dot_dimension_numbers<[1], [0], [0], [1], [0, 0, 1, 1], [], []>} : vector<16x32xf32>, vector<32x64xf32>, vector<16x64xf32> -> vector<16x64xf32>
    %c1_108 = arith.constant 1 : index
    %c0_109 = arith.constant 0 : index
    %c0_110 = arith.constant 0 : index
    %232 = vector.load %arg13[%c1_108, %c0_109, %c0_110] : memref<2x1x64xf32, #tpu.memory_space<vmem>>, vector<1x1x64xf32>
    %233 = vector.shape_cast %232 : vector<1x1x64xf32> to vector<1x64xf32>
    %234 = vector.broadcast %233 : vector<1x64xf32> to vector<16x64xf32>
    %235 = arith.addf %231, %234 : vector<16x64xf32>
    %236 = arith.mulf %235, %235 : vector<16x64xf32>
    %237 = arith.mulf %235, %236 : vector<16x64xf32>
    %cst_111 = arith.constant 4.471500e-02 : f32
    %238 = vector.broadcast %cst_111 : f32 to vector<16x64xf32>
    %239 = arith.mulf %238, %237 : vector<16x64xf32>
    %240 = arith.addf %235, %239 : vector<16x64xf32>
    %cst_112 = arith.constant 0.797884583 : f32
    %241 = vector.broadcast %cst_112 : f32 to vector<16x64xf32>
    %242 = arith.mulf %241, %240 : vector<16x64xf32>
    %243 = math.tanh %242 : vector<16x64xf32>
    %cst_113 = arith.constant 1.000000e+00 : f32
    %244 = vector.broadcast %cst_113 : f32 to vector<16x64xf32>
    %245 = arith.addf %244, %243 : vector<16x64xf32>
    %cst_114 = arith.constant 5.000000e-01 : f32
    %246 = vector.broadcast %cst_114 : f32 to vector<16x64xf32>
    %247 = arith.mulf %246, %245 : vector<16x64xf32>
    %248 = arith.mulf %235, %247 : vector<16x64xf32>
    %c1_115 = arith.constant 1 : index
    %c0_116 = arith.constant 0 : index
    %c0_117 = arith.constant 0 : index
    %249 = vector.load %arg14[%c1_115, %c0_116, %c0_117] : memref<2x64x32xf32, #tpu.memory_space<vmem>>, vector<1x64x32xf32>
    %250 = vector.shape_cast %249 : vector<1x64x32xf32> to vector<64x32xf32>
    %cst_118 = arith.constant dense<0.000000e+00> : vector<16x32xf32>
    %251 = tpu.matmul %248, %250, %cst_118 {dimension_numbers = #tpu.dot_dimension_numbers<[1], [0], [0], [1], [0, 0, 1, 1], [], []>} : vector<16x64xf32>, vector<64x32xf32>, vector<16x32xf32> -> vector<16x32xf32>
    %c1_119 = arith.constant 1 : index
    %c0_120 = arith.constant 0 : index
    %c0_121 = arith.constant 0 : index
    %252 = vector.load %arg15[%c1_119, %c0_120, %c0_121] : memref<2x1x32xf32, #tpu.memory_space<vmem>>, vector<1x1x32xf32>
    %253 = vector.shape_cast %252 : vector<1x1x32xf32> to vector<1x32xf32>
    %254 = vector.broadcast %253 : vector<1x32xf32> to vector<16x32xf32>
    %255 = arith.addf %251, %254 : vector<16x32xf32>
    %256 = arith.addf %228, %255 : vector<16x32xf32>
    %c1_122 = arith.constant 1 : index
    %c0_123 = arith.constant 0 : index
    %c0_124 = arith.constant 0 : index
    %257 = vector.load %arg16[%c1_122, %c0_123, %c0_124] : memref<2x1x32xf32, #tpu.memory_space<vmem>>, vector<1x1x32xf32>
    %258 = vector.shape_cast %257 : vector<1x1x32xf32> to vector<1x32xf32>
    %c1_125 = arith.constant 1 : index
    %c0_126 = arith.constant 0 : index
    %c0_127 = arith.constant 0 : index
    %259 = vector.load %arg17[%c1_125, %c0_126, %c0_127] : memref<2x1x32xf32, #tpu.memory_space<vmem>>, vector<1x1x32xf32>
    %260 = vector.shape_cast %259 : vector<1x1x32xf32> to vector<1x32xf32>
    %cst_128 = arith.constant dense<0.000000e+00> : vector<16xf32>
    %261 = vector.multi_reduction <add>, %256, %cst_128 [1] : vector<16x32xf32> to vector<16xf32>
    %262 = vector.shape_cast %261 : vector<16xf32> to vector<16x1xf32>
    %cst_129 = arith.constant 3.200000e+01 : f32
    %263 = vector.broadcast %cst_129 : f32 to vector<16x1xf32>
    %264 = arith.divf %262, %263 : vector<16x1xf32>
    %265 = vector.broadcast %264 : vector<16x1xf32> to vector<16x32xf32>
    %266 = arith.subf %256, %265 : vector<16x32xf32>
    %267 = arith.mulf %266, %266 : vector<16x32xf32>
    %cst_130 = arith.constant dense<0.000000e+00> : vector<16xf32>
    %268 = vector.multi_reduction <add>, %267, %cst_130 [1] : vector<16x32xf32> to vector<16xf32>
    %269 = vector.shape_cast %268 : vector<16xf32> to vector<16x1xf32>
    %cst_131 = arith.constant 3.200000e+01 : f32
    %270 = vector.broadcast %cst_131 : f32 to vector<16x1xf32>
    %271 = arith.divf %269, %270 : vector<16x1xf32>
    %cst_132 = arith.constant 9.99999996E-13 : f32
    %272 = vector.broadcast %cst_132 : f32 to vector<16x1xf32>
    %273 = arith.addf %271, %272 : vector<16x1xf32>
    %274 = math.rsqrt %273 : vector<16x1xf32>
    %275 = vector.broadcast %274 : vector<16x1xf32> to vector<16x32xf32>
    %276 = arith.mulf %266, %275 : vector<16x32xf32>
    %277 = vector.broadcast %258 : vector<1x32xf32> to vector<16x32xf32>
    %278 = arith.mulf %276, %277 : vector<16x32xf32>
    %279 = vector.broadcast %260 : vector<1x32xf32> to vector<16x32xf32>
    %280 = arith.addf %278, %279 : vector<16x32xf32>
    %c0_133 = arith.constant 0 : index
    %c0_134 = arith.constant 0 : index
    %281 = vector.load %arg20[%c0_133, %c0_134] : memref<16x32xf32, #tpu.memory_space<vmem>>, vector<16x32xf32>
    tpu.vector_store %arg20[%c0_133, %c0_134], %280 {strides = array<i32>} : memref<16x32xf32, #tpu.memory_space<vmem>>, vector<16x32xf32>,
    %282 = tpu.iota {dimensions = array<i32: 1>} : vector<2x16xi32>
    %283 = tpu.iota {dimensions = array<i32: 0>} : vector<2x16xi32>
    %c8_i32 = arith.constant 8 : i32
    %284 = vector.broadcast %c8_i32 : i32 to vector<2x16xi32>
    %285 = arith.muli %284, %283 : vector<2x16xi32>
    %286 = arith.cmpi eq, %282, %285 : vector<2x16xi32>
    %287 = arith.extui %286 : vector<2x16xi1> to vector<2x16xi32>
    %288 = arith.sitofp %287 : vector<2x16xi32> to vector<2x16xf32>
    %cst_135 = arith.constant dense<0.000000e+00> : vector<2x32xf32>
    %289 = tpu.matmul %288, %280, %cst_135 {dimension_numbers = #tpu.dot_dimension_numbers<[1], [0], [0], [1], [0, 0, 1, 1], [], []>} : vector<2x16xf32>, vector<16x32xf32>, vector<2x32xf32> -> vector<2x32xf32>
    %c0_136 = arith.constant 0 : index
    %c0_137 = arith.constant 0 : index
    %290 = vector.load %arg18[%c0_136, %c0_137] : memref<32x32xf32, #tpu.memory_space<vmem>>, vector<32x32xf32>
    %cst_138 = arith.constant dense<0.000000e+00> : vector<2x32xf32>
    %291 = tpu.matmul %289, %290, %cst_138 {dimension_numbers = #tpu.dot_dimension_numbers<[1], [0], [0], [1], [0, 0, 1, 1], [], []>} : vector<2x32xf32>, vector<32x32xf32>, vector<2x32xf32> -> vector<2x32xf32>
    %c0_139 = arith.constant 0 : index
    %c0_140 = arith.constant 0 : index
    %292 = vector.load %arg19[%c0_139, %c0_140] : memref<1x32xf32, #tpu.memory_space<vmem>>, vector<1x32xf32>
    %293 = vector.broadcast %292 : vector<1x32xf32> to vector<2x32xf32>
    %294 = arith.addf %291, %293 : vector<2x32xf32>
    %295 = math.tanh %294 : vector<2x32xf32>
    %c0_141 = arith.constant 0 : index
    %c0_142 = arith.constant 0 : index
    %296 = vector.load %arg21[%c0_141, %c0_142] : memref<2x32xf32, #tpu.memory_space<vmem>>, vector<2x32xf32>
    tpu.vector_store %arg21[%c0_141, %c0_142], %295 {strides = array<i32>} : memref<2x32xf32, #tpu.memory_space<vmem>>, vector<2x32xf32>,
    return
  }
}

</mosaic_0001>

<bundles_post_ra>
// kernel: bert_forward.1
= control target key start
LH: loop header
LB: loop body
LE: loop exit
PB: predicated region body
PF: predicated region fallthrough
CT: control target
= control target key end

     0   :  { %s3955_s0 = inlined_call_operand.vmem [shape: s32[16,1], index: 0, kind: input, shape index: {}]   ;;  %s3956_s1 = inlined_call_operand.vmem [shape: s32[2,8], index: 1, kind: input, shape index: {}]   ;;  %s3957_s2 = inlined_call_operand.vmem [shape: f32[100,32], index: 2, kind: input, shape index: {}]   ;;  %s3958_s3 = inlined_call_operand.vmem [shape: f32[16,32], index: 3, kind: input, shape index: {}]   ;;  %s3959_s4 = inlined_call_operand.vmem [shape: f32[1,32], index: 4, kind: input, shape index: {}]   ;;  %s3960_s5 = inlined_call_operand.vmem [shape: f32[1,32], index: 5, kind: input, shape index: {}]   ;;  %s3961_s6 = inlined_call_operand.vmem [shape: f32[2,32,96], index: 6, kind: input, shape index: {}]   ;;  %s3962_s7 = inlined_call_operand.vmem [shape: f32[2,1,96], index: 7, kind: input, shape index: {}]   ;;  %s3963_s8 = inlined_call_operand.vmem [shape: f32[2,32,32], index: 8, kind: input, shape index: {}]   ;;  %s3964_s9 = inlined_call_operand.vmem [shape: f32[2,1,32], index: 9, kind: input, shape index: {}]   ;;  %s3965_s10 = inlined_call_operand.vmem [shape: f32[2,1,32], index: 10, kind: input, shape index: {}]   ;;  %s3966_s11 = inlined_call_operand.vmem [shape: f32[2,1,32], index: 11, kind: input, shape index: {}]   ;;  %s3967_s12 = inlined_call_operand.vmem [shape: f32[2,32,64], index: 12, kind: input, shape index: {}]   ;;  %s3968_s13 = inlined_call_operand.vmem [shape: f32[2,1,64], index: 13, kind: input, shape index: {}]   ;;  %s3969_s14 = inlined_call_operand.vmem [shape: f32[2,64,32], index: 14, kind: input, shape index: {}]   ;;  %s3970_s15 = inlined_call_operand.vmem [shape: f32[2,1,32], index: 15, kind: input, shape index: {}]   ;;  %s3971_s16 = inlined_call_operand.vmem [shape: f32[2,1,32], index: 16, kind: input, shape index: {}]   ;;  %s3972_s17 = inlined_call_operand.vmem [shape: f32[2,1,32], index: 17, kind: input, shape index: {}]   ;;  %s3973_s18 = inlined_call_operand.vmem [shape: f32[32,32], index: 18, kind: input, shape index: {}]   ;;  %s3974_s19 = inlined_call_operand.vmem [shape: f32[1,32], index: 19, kind: input, shape index: {}]   ;;  %s3975_s20 = inlined_call_operand.hbm [shape: f32[16,32], index: 20, kind: output, shape index: {0}]   ;;  %s3976_s21 = inlined_call_operand.hbm [shape: f32[2,32], index: 21, kind: output, shape index: {1}]  }
   0x1   :  { %3979 = sst [smem:[#allocation8_spill]] %s3955_s0 }
   0x2   :  { %3980 = sst [smem:[#allocation9_spill]] %s3956_s1 }
   0x3   :  { %3981 = sst [smem:[#allocation10_spill]] %s3957_s2 }
   0x4   :  { %3982 = sst [smem:[#allocation11_spill]] %s3958_s3 }
   0x5   :  { %3983 = sst [smem:[#allocation12_spill]] %s3959_s4 }
   0x6   :  { %3984 = sst [smem:[#allocation13_spill]] %s3960_s5 }
   0x7   :  { %27 = vsyncpa [#allocation3], 0  ;;  %s3985_s26 = sld [smem:[#allocation8_spill]]  ;;  %vm106_vm0 = vcmask 1043456   ;;  %v3337_v2 = vmov 0  }
   0x8   :  { %s3986_s28 = sld [smem:[#allocation10_spill]]  ;;  %3230 = vset.pattern.permute.xlu0 %v3337_v2 }
   0xd   :  { %v69_v0 = vld [vmem:[%s3985_s26] sm:$0xff]  ;;  %v70_v5 = vld [vmem:[%s3985_s26 + $0x8] sm:$0xff] }
   0xe   :  { %v97_v1 = vld [vmem:[%s3986_s28 + $0x60] sm:$0xf]  ;;  %v96_v3 = vld [vmem:[%s3986_s28 + $0x58] sm:$0xff]  ;;  %74 = vperm.xlu0 %3230, %v69_v0   ;;  %v95_v4 = vld [vmem:[%s3986_s28 + $0x50] sm:$0xff] }
   0xf   :  { %2987 = vmatprep.subr.msk.mxu0 %vm106_vm0, %v97_v1  ;;  %v94_v6 = vld [vmem:[%s3986_s28 + $0x48] sm:$0xff] }
  0x10   :  { %2988 = vmatpush3.msk.msra.mxu0 %vm106_vm0, %v97_v1 }
  0x11   :  { %2989 = vmatprep.subr.mxu0 %v96_v3 }
  0x12   :  { %2990 = vmatpush3.msra.mxu0 %v96_v3 }
  0x13   :  { %2991 = vmatprep.subr.mxu0 %v95_v4 }
  0x14   :  { %28 = vsyncpa [#allocation5], 0  ;;  %77 = vperm.xlu0 %3230, %v70_v5   ;;  %2992 = vmatpush3.msra.mxu0 %v95_v4  ;;  %v93_v7 = vld [vmem:[%s3986_s28 + $0x40] sm:$0xff]  ;;  %v92_v8 = vld [vmem:[%s3986_s28 + $0x38] sm:$0xff]  ;;  %v3338_v16 = vmov 0.0   ;;  %v71_v17 = vlaneseq  ;;  %vm99_vm1 = vcmask 818176  }
  0x15   :  { %2993 = vmatprep.subr.mxu0 %v94_v6  ;;  %v91_v9 = vld [vmem:[%s3986_s28 + $0x30] sm:$0xff]  ;;  %v90_v10 = vld [vmem:[%s3986_s28 + $0x28] sm:$0xff]  ;;  %v89_v11 = vld [vmem:[%s3986_s28 + $0x20] sm:$0xff]  ;;  %s3987_s3 = sld [smem:[#allocation11_spill]]  ;;  %vm187_vm4 = vcmask 261120   ;;  %vm3339_vm5 = vmmov 0  }
  0x16   :  { %2994 = vmatpush3.msra.mxu0 %v94_v6  ;;  %v88_v12 = vld [vmem:[%s3986_s28 + $0x18] sm:$0xff]  ;;  %v87_v13 = vld [vmem:[%s3986_s28 + $0x10] sm:$0xff]  ;;  %v86_v14 = vld [vmem:[%s3986_s28 + $0x8] sm:$0xff]  ;;  %v3506_v18 = vand.u32 127, %v71_v17  ;;  %s3988_s25 = sld [smem:[#allocation12_spill]]  ;;  %s3340_s0 = smov 112  }
  0x17   :  { %2995 = vmatprep.subr.mxu0 %v93_v7  ;;  %v85_v15 = vld [vmem:[%s3986_s28] sm:$0xff]  ;;  %v271_v40 = vld [vmem:[%s3961_s6 + $0x18] sm:$0xff]  ;;  %v270_v41 = vld [vmem:[%s3961_s6 + $0x10] sm:$0xff]  ;;  %s3989_s26 = sld [smem:[#allocation13_spill]]  ;;  %s3341_s4 = smov 96   ;;  %vm368_vm6 = vcmask 130048  }
  0x18   :  { %2996 = vmatpush3.msra.mxu0 %v93_v7  ;;  %3016 = vmatprep.subr.mxu1 %v271_v40  ;;  %v269_v42 = vld [vmem:[%s3961_s6 + $0x8] sm:$0xff]  ;;  %v268_v43 = vld [vmem:[%s3961_s6] sm:$0xff]  ;;  %s3990_s22 = sld [smem:[#allocation9_spill]]  ;;  %vm671_vm7 = vcmask 64512   ;;  %s3343_s23 = smov 64   ;;  %vm1293_vm8 = vcmask 523264  }
  0x19   :  { %2997 = vmatprep.subr.mxu0 %v92_v8  ;;  %3017 = vmatpush3.msra.mxu1 %v271_v40  ;;  %v2788_v61 = vld [vmem:[%s3962_s7] ss:$0 sm:$0xff]  ;;  %s3344_s29 = smov 16   ;;  %s3345_s24 = smov [#allocation2]  }
  0x1a   :  { %2998 = vmatpush3.msra.mxu0 %v92_v8  ;;  %3018 = vmatprep.subr.mxu1 %v270_v41  ;;  %v3342_v8 = vmov 1966171168   ;;  %s2756_s2 = sshll.u32 %s3345_s24, 4  ;;  %s2757_s2 = int_to_ptr.vmem [resolvable:$true] %s2756_s2 }
  0x1b   :  { %2999 = vmatprep.subr.mxu0 %v91_v9  ;;  %v98_v24 = vld [vmem:[%s3987_s3] sm:$0xff]  ;;  %3019 = vmatpush3.msra.mxu1 %v270_v41  ;;  %p3298_p1 = scmp.lt.s32.totalorder %s2757_s2, %s2757_s2 }
  0x1c   :  { %3000 = vmatpush3.msra.mxu0 %v91_v9  ;;  %3020 = vmatprep.subr.mxu1 %v269_v42  ;;  %v2786_v51 = vld [vmem:[%s3988_s25] ss:$0 sm:$0xff]  ;;  %v237_v9 = vunpack.c.l.s4 %v3342_v8  ;;  %s3293_s25 = scalar_lea.vmem %s2757_s2, 256 }
  0x1d   :  { %3001 = vmatprep.subr.mxu0 %v90_v10  ;;  %3021 = vmatpush3.msra.mxu1 %v269_v42  ;;  %v2787_v53 = vld [vmem:[%s3989_s26] ss:$0 sm:$0xff]  ;;  %p3294_p0 = scmp.ne.s32.totalorder %s2757_s2, %s3293_s25  ;;  %p3299_p2 = scmp.lt.s32.totalorder %s3293_s25, %s3293_s25 }
  0x1e   :  { %3002 = vmatpush3.msra.mxu0 %v90_v10  ;;  %3022 = vmatprep.subr.mxu1 %v268_v43  ;;  %v231_v7 = vld [vmem:[%s3990_s22] sm:$0x3] }
  0x1f   :  { %3003 = vmatprep.subr.mxu0 %v89_v11  ;;  %3023 = vmatpush3.msra.mxu1 %v268_v43  ;;  %v232_v10 = vcvt.s32.f32 %v231_v7  ;;  %p3300_p3 = por %p3299_p2, %p3298_p1 }
  0x20   :  { %3004 = vmatpush3.msra.mxu0 %v89_v11  ;;  %3027 = vmatprep.subr.mxu1 %v3338_v16  ;;  %v238_v11 = vunpack.c.0.s8 %v237_v9 }
  0x21   :  { %3005 = vmatprep.subr.mxu0 %v88_v12  ;;  %p3301_p4 = pnand %p3300_p3, %p3294_p0 }
  0x22   :  { %3006 = vmatpush3.msra.mxu0 %v88_v12  ;;  %v3601_v12 = vshrl.u32 %v71_v17, 7 }
  0x23   :  { %3007 = vmatprep.subr.mxu0 %v87_v13 }
  0x24   :  { %3008 = vmatpush3.msra.mxu0 %v87_v13  ;;  %v233_v13 = vsub.f32 1.0, %v232_v10 }
  0x25   :  { %3009 = vmatprep.subr.mxu0 %v86_v14 }
  0x26   :  { %3010 = vmatpush3.msra.mxu0 %v86_v14  ;;  %v241_v14 = vsub.s32 %v238_v11, %v3601_v12 }
  0x27   :  { %3011 = vmatprep.subr.mxu0 %v85_v15 }
  0x28   :  { %3012 = vmatpush3.msra.mxu0 %v85_v15  ;;  %v234_v15 = vmul.f32 -1e+09, %v233_v13 }
  0x29   :  { %3052 = vmatprep.subr.mxu0 %v3338_v16 }
  0x89   :  { %v75_v19 = vpop.permute.xlu0 %74 }
  0x8a   :  { %vm79_vm2 = vcmp.eq.s32.totalorder %v3506_v18, %v75_v19  ;;  %v242_v19 = vrot.slane %v234_v15, %v241_v14 }
  0x8b   :  { %v2781_v20 = vsel %vm79_vm2, 1.0, %v3338_v16 }
  0x8c   :  { %3013 = vmatprep.mubr.msk.f32.mxu0 %vm99_vm1, %v2781_v20  ;;  %v250_v20 = vrot.slane %v242_v19, %v241_v14 }
  0x8f   :  { %v78_v21 = vpop.permute.xlu0 %77 }
  0x90   :  { %vm80_vm3 = vcmp.eq.s32.totalorder %v3506_v18, %v78_v21  ;;  %v260_v21 = vsub.s32 0, %v3601_v12 }
  0x91   :  { %v2782_v22 = vsel %vm80_vm3, 1.0, %v3338_v16 }
  0x92   :  { %3014 = vmatmul.mubr.msk.f32.vlgmr.msra.gmra.mxu0 %vm99_vm1, %v2782_v22  ;;  %v243_v22 = vcombine.high %v242_v19, %v242_v19  ;;  %v1033_v19 = vld [vmem:[%s3963_s8 + $0x18] sm:$0xff] }
  0x93   :  { %3054 = vmatprep.mubr.msk.f32.mxu0 %vm3339_vm5, %v3338_v16 }
 0x152   :  { %v3015_v23 = vpop.f32.mrf.mxu0 }
 0x153   :  { %v182_v27 = vadd.f32 %v3015_v23, %v98_v24  ;;  %v3605_v23 = vrot.slane %v250_v20, %v260_v21  ;;  %v1032_v20 = vld [vmem:[%s3963_s8 + $0x10] sm:$0xff] }
 0x154   :  { %v176_v25 = vpop.f32.mrf.mxu0 }
 0x155   :  { %v177_v26 = vadd.f32 %v176_v25, %v98_v24  ;;  %v191_v29 = vsel %vm187_vm4, %v182_v27, 0.0  ;;  %v257_v24 = vrot.slane %v243_v22, %v241_v14 }
 0x157   :  { %v188_v28 = vsel %vm187_vm4, %v177_v26, 0.0 }
 0x158   :  { %189 = vadd.xlane.f32.xlu1 %v188_v28 }
 0x15c   :  { %192 = vadd.xlane.f32.xlu1 %v191_v29 }
 0x1e1   :  { %v190_v30 = vpop.xlane.xlu1 %189 }
 0x1e2   :  { %v195_v31 = vmul.f32 0.03125, %v190_v30 }
 0x1e4   :  { %v197_v32 = vsub.f32 %v177_v26, %v195_v31 }
 0x1e5   :  { %v193_v33 = vpop.xlane.xlu1 %192 }
 0x1e6   :  { %v196_v34 = vmul.f32 0.03125, %v193_v33  ;;  %v199_v35 = vmul.f32 %v197_v32, %v197_v32 }
 0x1e8   :  { %v198_v36 = vsub.f32 %v182_v27, %v196_v34  ;;  %v201_v37 = vsel %vm187_vm4, %v199_v35, 0.0  ;;  %v3608_v27 = vrot.slane %v257_v24, %v260_v21  ;;  %v1031_v24 = vld [vmem:[%s3963_s8 + $0x8] sm:$0xff] }
 0x1e9   :  { %202 = vadd.xlane.f32.xlu0 %v201_v37 }
 0x1ea   :  { %v200_v38 = vmul.f32 %v198_v36, %v198_v36 }
 0x1ec   :  { %v204_v39 = vsel %vm187_vm4, %v200_v38, 0.0 }
 0x1ed   :  { %205 = vadd.xlane.f32.xlu1 %v204_v39 }
 0x272   :  { %v203_v44 = vpop.xlane.xlu0 %202 }
 0x273   :  { %v207_v45 = vmul.f32 0.03125, %v203_v44 }
 0x275   :  { %v209_v46 = vadd.f32 1e-12, %v207_v45 }
 0x276   :  { %v206_v47 = vpop.xlane.xlu1 %205 }
 0x277   :  { %3231 = vrsqrt.f32 %v209_v46  ;;  %v208_v48 = vmul.f32 0.03125, %v206_v47 }
 0x279   :  { %v210_v49 = vadd.f32 1e-12, %v208_v48 }
 0x27b   :  { %3233 = vrsqrt.f32 %v210_v49 }
 0x284   :  { %v3232_v50 = vpop.eup %3231 }
 0x285   :  { %v213_v52 = vmul.f32 %v3232_v50, %v197_v32 }
 0x287   :  { %v221_v54 = vmul.f32 %v2786_v51, %v213_v52 }
 0x288   :  { %v3234_v55 = vpop.eup %3233 }
 0x289   :  { %v214_v56 = vmul.f32 %v3234_v55, %v198_v36  ;;  %v3538_v57 = vadd.f32 %v2787_v53, %v221_v54 }
 0x28b   :  { %v222_v58 = vmul.f32 %v2786_v51, %v214_v56  ;;  %3024 = vmatprep.mubr.msk.f32.mxu1 %vm187_vm4, %v3538_v57 }
 0x28d   :  { %v3542_v59 = vadd.f32 %v2787_v53, %v222_v58 }
 0x28f   :  { %3025 = vmatmul.mubr.msk.f32.vlgmr.msra.gmra.mxu1 %vm187_vm4, %v3542_v59 }
 0x290   :  { %3029 = vmatprep.mubr.msk.f32.mxu1 %vm3339_vm5, %v3338_v16 }
 0x34f   :  { %v3026_v60 = vpop.f32.mrf.mxu1 }
 0x350   :  { %v3557_v0 = vadd.f32 %v3026_v60, %v2788_v61 }
 0x351   :  { %v351_v62 = vpop.f32.mrf.mxu1 }
 0x352   :  { %v3553_v63 = vadd.f32 %v2788_v61, %v351_v62 }
 0x354   :  { %362 = vrot.lane.b32.xlu1 %v3553_v63, %s3340_s0 }
 0x358   :  { %364 = vrot.lane.b32.xlu1 %v3557_v0, %s3340_s0 }
 0x35c   :  { %366 = vrot.lane.b32.xlu1 %v3553_v63, %s3341_s4 }
 0x360   :  { %443 = vrot.lane.b32.xlu1 %v3557_v0, %s3341_s4 }
 0x3c6   :  { %v3565_v1 = vpop.permute.xlu1 %362 }
 0x3c7   :  { %519 = vrot.lane.b32.xlu0 %v3565_v1, %s3341_s4 }
 0x3ca   :  { %v3569_v2 = vpop.permute.xlu1 %364 }
 0x3cb   :  { %595 = vrot.lane.b32.xlu1 %v3569_v2, %s3341_s4 }
 0x3ce   :  { %v367_v3 = vpop.permute.xlu1 %366 }
 0x3cf   :  { %3028 = vmatpush3.xpose.msk.msra.mxu1 %vm368_vm6, %v367_v3 }
 0x3d0   :  { %3032 = vmatprep.subr.mxu1 %v3338_v16 }
 0x3d2   :  { %3030 = vmatmul.mubr.msk.f32.vlgmr.msra.gmra.mxu1 %vm368_vm6, %v3553_v63  ;;  %v444_v4 = vpop.permute.xlu1 %443 }
 0x3d3   :  { %3033 = vmatpush3.xpose.msk.msra.mxu1 %vm368_vm6, %v444_v4  ;;  %3034 = vmatprep.mubr.msk.f32.mxu1 %vm3339_vm5, %v3338_v16 }
 0x3d4   :  { %3037 = vmatprep.subr.mxu1 %v3338_v16 }
 0x3d6   :  { %3035 = vmatmul.mubr.msk.f32.vlgmr.msra.gmra.mxu1 %vm368_vm6, %v3557_v0 }
 0x3d7   :  { %3039 = vmatprep.mubr.msk.f32.mxu1 %vm3339_vm5, %v3338_v16 }
 0x439   :  { %v520_v5 = vpop.permute.xlu0 %519 }
 0x43a   :  { %3038 = vmatpush3.xpose.msk.msra.mxu1 %vm368_vm6, %v520_v5 }
 0x43b   :  { %3042 = vmatprep.subr.mxu1 %v3338_v16 }
 0x43d   :  { %3040 = vmatmul.mubr.msk.f32.vlgmr.msra.gmra.mxu1 %vm368_vm6, %v3565_v1  ;;  %v596_v6 = vpop.permute.xlu1 %595 }
 0x43e   :  { %3043 = vmatpush3.xpose.msk.msra.mxu1 %vm368_vm6, %v596_v6  ;;  %3044 = vmatprep.mubr.msk.f32.mxu1 %vm3339_vm5, %v3338_v16 }
 0x43f   :  { %3047 = vmatprep.subr.mxu1 %v3338_v16 }
 0x441   :  { %3045 = vmatmul.mubr.msk.f32.vlgmr.msra.gmra.mxu1 %vm368_vm6, %v3569_v2 }
 0x442   :  { %3049 = vmatprep.mubr.msk.f32.mxu1 %vm3339_vm5, %v3338_v16 }
 0x492   :  { %v439_v25 = vpop.f32.mrf.mxu1 }
 0x493   :  { %v440_v26 = vadd.f32 %v439_v25, %v3605_v23  ;;  %v1030_v25 = vld [vmem:[%s3963_s8] sm:$0xff] }
 0x494   :  { %v3031_v17 = vpop.f32.mrf.mxu1 }
 0x495   :  { %v672_v28 = vsel %vm671_vm7, %v440_v26, -inf }
 0x496   :  { %673 = vmax.xlane.f32.xlu1 %v672_v28  ;;  %v515_v29 = vpop.f32.mrf.mxu1 }
 0x497   :  { %v516_v30 = vadd.f32 %v515_v29, %v3608_v27 }
 0x498   :  { %v3036_v31 = vpop.f32.mrf.mxu1 }
 0x499   :  { %v675_v32 = vsel %vm671_vm7, %v516_v30, -inf }
 0x49a   :  { %676 = vmax.xlane.f32.xlu0 %v675_v32 }
 0x4fd   :  { %v591_v33 = vpop.f32.mrf.mxu1 }
 0x4fe   :  { %v592_v34 = vadd.f32 %v591_v33, %v3605_v23 }
 0x4ff   :  { %v3041_v35 = vpop.f32.mrf.mxu1 }
 0x500   :  { %v678_v36 = vsel %vm671_vm7, %v592_v34, -inf }
 0x501   :  { %679 = vmax.xlane.f32.xlu1 %v678_v36  ;;  %v667_v37 = vpop.f32.mrf.mxu1  ;;  %v2803_v36 = vld [vmem:[%s3964_s9] ss:$0 sm:$0xff] }
 0x502   :  { %v668_v38 = vadd.f32 %v667_v37, %v3608_v27 }
 0x503   :  { %v3046_v39 = vpop.f32.mrf.mxu1 }
 0x504   :  { %v681_v40 = vsel %vm671_vm7, %v668_v38, -inf }
 0x505   :  { %682 = vmax.xlane.f32.xlu1 %v681_v40 }
 0x516   :  { %716 = vrot.lane.b32.xlu1 %v3553_v63, %s3343_s23 }
 0x51f   :  { %v674_v41 = vpop.xlane.xlu1 %673 }
 0x520   :  { %v684_v42 = vsub.f32 %v440_v26, %v674_v41 }
 0x522   :  { %v688_v45 = vmul.f32 1.442695, %v684_v42 }
 0x523   :  { %v677_v43 = vpop.xlane.xlu0 %676 }
 0x524   :  { %v685_v44 = vsub.f32 %v516_v30, %v677_v43 }
 0x526   :  { %v690_v46 = vmul.f32 1.442695, %v685_v44 }
 0x528   :  { %3235 = vpow2.f32 %v690_v46 }
 0x529   :  { %3237 = vpow2.f32 %v688_v45 }
 0x535   :  { %v3236_v47 = vpop.eup %3235 }
 0x536   :  { %v3238_v48 = vpop.eup %3237  ;;  %v699_v49 = vsel %vm671_vm7, %v3236_v47, 0.0 }
 0x537   :  { %700 = vadd.xlane.f32.xlu0 %v699_v49  ;;  %v696_v50 = vsel %vm671_vm7, %v3238_v48, 0.0 }
 0x53a   :  { %697 = vadd.xlane.f32.xlu1 %v696_v50 }
 0x58a   :  { %v680_v51 = vpop.xlane.xlu1 %679 }
 0x58b   :  { %v686_v52 = vsub.f32 %v592_v34, %v680_v51 }
 0x58d   :  { %v692_v53 = vmul.f32 1.442695, %v686_v52 }
 0x58e   :  { %v683_v54 = vpop.xlane.xlu1 %682 }
 0x58f   :  { %3239 = vpow2.f32 %v692_v53  ;;  %v687_v55 = vsub.f32 %v668_v38, %v683_v54  ;;  %v1170_v54 = vld [vmem:[%s3967_s12 + $0x10] sm:$0xff] }
 0x591   :  { %v694_v56 = vmul.f32 1.442695, %v687_v55  ;;  %v1169_v55 = vld [vmem:[%s3967_s12 + $0x8] sm:$0xff] }
 0x592   :  { %v717_v58 = vpop.permute.xlu1 %716 }
 0x593   :  { %3241 = vpow2.f32 %v694_v56  ;;  %3048 = vmatpush3.msra.mxu1 %v717_v58  ;;  %v1168_v56 = vld [vmem:[%s3967_s12] sm:$0xff] }
 0x594   :  { %3057 = vmatprep.subr.mxu1 %v3338_v16 }
 0x59c   :  { %v3240_v60 = vpop.eup %3239 }
 0x59d   :  { %v702_v61 = vsel %vm671_vm7, %v3240_v60, 0.0 }
 0x59e   :  { %703 = vadd.xlane.f32.xlu1 %v702_v61 }
 0x5a0   :  { %v3242_v62 = vpop.eup %3241 }
 0x5a1   :  { %v705_v63 = vsel %vm671_vm7, %v3242_v62, 0.0 }
 0x5a2   :  { %706 = vadd.xlane.f32.xlu0 %v705_v63 }
 0x5af   :  { %868 = vrot.lane.b32.xlu1 %v3565_v1, %s3343_s23 }
 0x5b3   :  { %944 = vrot.lane.b32.xlu1 %v3569_v2, %s3343_s23 }
 0x5b8   :  { %792 = vrot.lane.b32.xlu0 %v3557_v0, %s3343_s23 }
 0x5c0   :  { %v701_v6 = vpop.xlane.xlu0 %700 }
 0x5c3   :  { %v698_v3 = vpop.xlane.xlu1 %697 }
 0x5c4   :  { %3243 = vrcp.f32 %v698_v3 }
 0x5c5   :  { %3245 = vrcp.f32 %v701_v6 }
 0x5d1   :  { %v3244_v4 = vpop.eup %3243 }
 0x5d2   :  { %v712_v5 = vmul.f32 %v3244_v4, %v3238_v48  ;;  %v3246_v9 = vpop.eup %3245 }
 0x5d3   :  { %v713_v0 = vmul.f32 %v3246_v9, %v3236_v47 }
 0x5d4   :  { %3050 = vmatmul.mubr.msk.f32.vlgmr.msra.gmra.mxu1 %vm671_vm7, %v712_v5  ;;  %v2806_v5 = vld [vmem:[%s3965_s10] ss:$0 sm:$0xff] }
 0x5d5   :  { %3059 = vmatprep.mubr.msk.f32.mxu1 %vm3339_vm5, %v3338_v16 }
 0x627   :  { %v704_v7 = vpop.xlane.xlu1 %703 }
 0x628   :  { %3247 = vrcp.f32 %v704_v7  ;;  %v2807_v7 = vld [vmem:[%s3966_s11] ss:$0 sm:$0xff] }
 0x62b   :  { %v707_v1 = vpop.xlane.xlu0 %706  ;;  %v869_v8 = vpop.permute.xlu1 %868 }
 0x62c   :  { %3249 = vrcp.f32 %v707_v1  ;;  %3058 = vmatpush3.msra.mxu1 %v869_v8 }
 0x62d   :  { %3067 = vmatprep.subr.mxu1 %v1033_v19 }
 0x62f   :  { %v793_v2 = vpop.permute.xlu0 %792  ;;  %v945_v10 = vpop.permute.xlu1 %944 }
 0x630   :  { %3053 = vmatpush3.msra.mxu0 %v793_v2 }
 0x631   :  { %3055 = vmatmul.mubr.msk.f32.vlgmr.msra.gmra.mxu0 %vm671_vm7, %v713_v0  ;;  %3062 = vmatprep.subr.mxu0 %v3338_v16 }
 0x632   :  { %3063 = vmatpush3.msra.mxu0 %v945_v10  ;;  %3064 = vmatprep.mubr.msk.f32.mxu0 %vm3339_vm5, %v3338_v16 }
 0x635   :  { %v3248_v11 = vpop.eup %3247 }
 0x636   :  { %v714_v13 = vmul.f32 %v3248_v11, %v3240_v60  ;;  %v1285_v11 = vld [vmem:[%s3969_s14 + $0x38] sm:$0xff] }
 0x638   :  { %3060 = vmatmul.mubr.msk.f32.vlgmr.msra.gmra.mxu1 %vm671_vm7, %v714_v13  ;;  %v1284_v13 = vld [vmem:[%s3969_s14 + $0x30] sm:$0xff] }
 0x639   :  { %v3250_v14 = vpop.eup %3249  ;;  %3068 = vmatpush3.msra.mxu1 %v1033_v19  ;;  %v1281_v19 = vld [vmem:[%s3969_s14 + $0x18] sm:$0xff] }
 0x63a   :  { %v715_v15 = vmul.f32 %v3250_v14, %v3242_v62  ;;  %3069 = vmatprep.subr.mxu1 %v1032_v20  ;;  %v1283_v14 = vld [vmem:[%s3969_s14 + $0x28] sm:$0xff] }
 0x63b   :  { %3070 = vmatpush3.msra.mxu1 %v1032_v20  ;;  %v1280_v20 = vld [vmem:[%s3969_s14 + $0x10] sm:$0xff] }
 0x63c   :  { %3065 = vmatmul.mubr.msk.f32.vlgmr.msra.gmra.mxu0 %vm671_vm7, %v715_v15  ;;  %3071 = vmatprep.subr.mxu1 %v1031_v24  ;;  %v1282_v15 = vld [vmem:[%s3969_s14 + $0x20] sm:$0xff] }
 0x63d   :  { %3072 = vmatpush3.msra.mxu1 %v1031_v24  ;;  %v2808_v24 = vld [vmem:[%s3968_s13] ss:$0 sm:$0xff] }
 0x63e   :  { %3073 = vmatprep.subr.mxu1 %v1030_v25 }
 0x63f   :  { %3074 = vmatpush3.msra.mxu1 %v1030_v25 }
 0x640   :  { %3089 = vmatprep.subr.mxu1 %v1285_v11 }
 0x694   :  { %v788_v21 = vpop.f32.mrf.mxu1 }
 0x696   :  { %v3051_v22 = vpop.f32.mrf.mxu1 }
 0x697   :  { %v1278_v22 = vld [vmem:[%s3969_s14] sm:$0xff] }
 0x6f1   :  { %v864_v26 = vpop.f32.mrf.mxu0 }
 0x6f3   :  { %v3056_v17 = vpop.f32.mrf.mxu0 }
 0x6f8   :  { %v940_v28 = vpop.f32.mrf.mxu1 }
 0x6f9   :  { %1022 = vrot.lane.b32.xlu0 %v940_v28, %s3344_s29 }
 0x6fa   :  { %v3061_v29 = vpop.f32.mrf.mxu1 }
 0x6fc   :  { %v1016_v30 = vpop.f32.mrf.mxu0 }
 0x6fd   :  { %1024 = vrot.lane.b32.xlu1 %v1016_v30, %s3344_s29 }
 0x6fe   :  { %v3066_v31 = vpop.f32.mrf.mxu0 }
 0x76b   :  { %v1023_v32 = vpop.permute.xlu0 %1022 }
 0x76c   :  { %v1028_v33 = vsel %vm368_vm6, %v788_v21, %v1023_v32  ;;  %v1279_v21 = vld [vmem:[%s3969_s14 + $0x8] sm:$0xff] }
 0x76d   :  { %3075 = vmatprep.mubr.msk.f32.mxu1 %vm187_vm4, %v1028_v33 }
 0x76f   :  { %v1025_v34 = vpop.permute.xlu1 %1024 }
 0x770   :  { %v1029_v35 = vsel %vm368_vm6, %v864_v26, %v1025_v34 }
 0x771   :  { %3076 = vmatmul.mubr.msk.f32.vlgmr.msra.gmra.mxu1 %vm187_vm4, %v1029_v35 }
 0x772   :  { %3090 = vmatpush3.msra.mxu1 %v1285_v11 }
 0x773   :  { %3091 = vmatprep.subr.mxu1 %v1284_v13 }
 0x774   :  { %3092 = vmatpush3.msra.mxu1 %v1284_v13 }
 0x775   :  { %3093 = vmatprep.subr.mxu1 %v1283_v14 }
 0x776   :  { %3094 = vmatpush3.msra.mxu1 %v1283_v14  ;;  %v2814_v14 = vld [vmem:[%s3971_s16] ss:$0 sm:$0xff] }
 0x777   :  { %3095 = vmatprep.subr.mxu1 %v1282_v15 }
 0x778   :  { %3096 = vmatpush3.msra.mxu1 %v1282_v15 }
 0x779   :  { %3097 = vmatprep.subr.mxu1 %v1281_v19 }
 0x77a   :  { %3098 = vmatpush3.msra.mxu1 %v1281_v19 }
 0x77b   :  { %3099 = vmatprep.subr.mxu1 %v1280_v20 }
 0x77c   :  { %3100 = vmatpush3.msra.mxu1 %v1280_v20 }
 0x77d   :  { %3101 = vmatprep.subr.mxu1 %v1279_v21 }
 0x77e   :  { %3102 = vmatpush3.msra.mxu1 %v1279_v21 }
 0x77f   :  { %3103 = vmatprep.subr.mxu1 %v1278_v22 }
 0x780   :  { %3104 = vmatpush3.msra.mxu1 %v1278_v22  ;;  %v2815_v22 = vld [vmem:[%s3972_s17] ss:$0 sm:$0xff] }
 0x781   :  { %3129 = vmatprep.subr.mxu1 %v3338_v16 }
 0x831   :  { %v3077_v37 = vpop.f32.mrf.mxu1 }
 0x832   :  { %v1119_v38 = vadd.f32 %v3077_v37, %v2803_v36 }
 0x833   :  { %v1113_v39 = vpop.f32.mrf.mxu1 }
 0x834   :  { %v1114_v40 = vadd.f32 %v2803_v36, %v1113_v39  ;;  %v1123_v41 = vadd.f32 %v1119_v38, %v3542_v59 }
 0x836   :  { %v1129_v42 = vsel %vm187_vm4, %v1123_v41, 0.0  ;;  %v1122_v43 = vadd.f32 %v1114_v40, %v3538_v57  ;;  %v1171_v57 = vld [vmem:[%s3967_s12 + $0x18] sm:$0xff] }
 0x837   :  { %1130 = vadd.xlane.f32.xlu1 %v1129_v42  ;;  %3078 = vmatprep.subr.mxu0 %v1171_v57 }
 0x838   :  { %v1126_v44 = vsel %vm187_vm4, %v1122_v43, 0.0  ;;  %3079 = vmatpush3.msra.mxu0 %v1171_v57 }
 0x839   :  { %1127 = vadd.xlane.f32.xlu0 %v1126_v44  ;;  %3080 = vmatprep.subr.mxu0 %v1170_v54 }
 0x83a   :  { %3081 = vmatpush3.msra.mxu0 %v1170_v54 }
 0x83b   :  { %3082 = vmatprep.subr.mxu0 %v1169_v55 }
 0x83c   :  { %3083 = vmatpush3.msra.mxu0 %v1169_v55 }
 0x83d   :  { %3084 = vmatprep.subr.mxu0 %v1168_v56 }
 0x83e   :  { %3085 = vmatpush3.msra.mxu0 %v1168_v56 }
 0x8c0   :  { %v1131_v45 = vpop.xlane.xlu1 %1130 }
 0x8c1   :  { %v1133_v46 = vmul.f32 0.03125, %v1131_v45 }
 0x8c2   :  { %v1128_v47 = vpop.xlane.xlu0 %1127 }
 0x8c3   :  { %v1132_v48 = vmul.f32 0.03125, %v1128_v47  ;;  %v1135_v49 = vsub.f32 %v1123_v41, %v1133_v46  ;;  %v2811_v47 = vld [vmem:[%s3970_s15] ss:$0 sm:$0xff] }
 0x8c5   :  { %v1134_v50 = vsub.f32 %v1122_v43, %v1132_v48  ;;  %v1137_v53 = vmul.f32 %v1135_v49, %v1135_v49 }
 0x8c7   :  { %v1136_v51 = vmul.f32 %v1134_v50, %v1134_v50  ;;  %v1141_v59 = vsel %vm187_vm4, %v1137_v53, 0.0 }
 0x8c9   :  { %v1138_v52 = vsel %vm187_vm4, %v1136_v51, 0.0 }
 0x8ca   :  { %1139 = vadd.xlane.f32.xlu0 %v1138_v52 }
 0x8ce   :  { %1142 = vadd.xlane.f32.xlu0 %v1141_v59 }
 0x953   :  { %v1140_v58 = vpop.xlane.xlu0 %1139 }
 0x954   :  { %v1144_v60 = vmul.f32 0.03125, %v1140_v58 }
 0x956   :  { %v1146_v61 = vadd.f32 1e-12, %v1144_v60 }
 0x957   :  { %v1143_v62 = vpop.xlane.xlu0 %1142 }
 0x958   :  { %3251 = vrsqrt.f32 %v1146_v61  ;;  %v1145_v63 = vmul.f32 0.03125, %v1143_v62 }
 0x95a   :  { %v1147_v3 = vadd.f32 1e-12, %v1145_v63 }
 0x95c   :  { %3253 = vrsqrt.f32 %v1147_v3 }
 0x965   :  { %v3252_v4 = vpop.eup %3251 }
 0x966   :  { %v1150_v6 = vmul.f32 %v3252_v4, %v1134_v50 }
 0x968   :  { %v1158_v1 = vmul.f32 %v2806_v5, %v1150_v6  ;;  %v2818_v6 = vld [vmem:[%s3961_s6 + $0x30] sm:$0xff] }
 0x969   :  { %v3254_v8 = vpop.eup %3253 }
 0x96a   :  { %v1151_v9 = vmul.f32 %v3254_v8, %v1135_v49  ;;  %v3684_v2 = vadd.f32 %v2807_v7, %v1158_v1  ;;  %v2816_v1 = vld [vmem:[%s3961_s6 + $0x20] sm:$0xff] }
 0x96c   :  { %v1159_v0 = vmul.f32 %v2806_v5, %v1151_v9  ;;  %3086 = vmatprep.mubr.msk.f32.mxu0 %vm187_vm4, %v3684_v2  ;;  %v2819_v5 = vld [vmem:[%s3961_s6 + $0x38] sm:$0xff] }
 0x96d   :  { %3108 = vmatprep.subr.mxu0 %v2819_v5 }
 0x96e   :  { %v1167_v10 = vadd.f32 %v2807_v7, %v1159_v0  ;;  %v2817_v7 = vld [vmem:[%s3961_s6 + $0x28] sm:$0xff] }
 0x970   :  { %3087 = vmatmul.mubr.msk.f32.vlgmr.msra.gmra.mxu0 %vm187_vm4, %v1167_v10 }
 0x971   :  { %3109 = vmatpush3.msra.mxu0 %v2819_v5 }
 0x972   :  { %3110 = vmatprep.subr.mxu0 %v2818_v6 }
 0x973   :  { %3111 = vmatpush3.msra.mxu0 %v2818_v6 }
 0x974   :  { %3112 = vmatprep.subr.mxu0 %v2817_v7 }
 0x975   :  { %3113 = vmatpush3.msra.mxu0 %v2817_v7 }
 0x976   :  { %3114 = vmatprep.subr.mxu0 %v2816_v1 }
 0x977   :  { %3115 = vmatpush3.msra.mxu0 %v2816_v1 }
 0x978   :  { %3119 = vmatprep.subr.mxu0 %v3338_v16 }
 0xa30   :  { %v3088_v25 = vpop.f32.mrf.mxu0 }
 0xa31   :  { %v1257_v26 = vadd.f32 %v3088_v25, %v2808_v24 }
 0xa32   :  { %v1251_v17 = vpop.f32.mrf.mxu0 }
 0xa33   :  { %v1261_v28 = vmul.f32 %v1257_v26, %v1257_v26  ;;  %v1252_v29 = vadd.f32 %v2808_v24, %v1251_v17  ;;  %v2821_v17 = vld [vmem:[%s3962_s7 + $0x1] ss:$0 sm:$0xff] }
 0xa35   :  { %v1263_v30 = vmul.f32 %v1261_v28, %v1257_v26  ;;  %v1260_v31 = vmul.f32 %v1252_v29, %v1252_v29 }
 0xa37   :  { %v1265_v32 = vmul.f32 0.044715, %v1263_v30  ;;  %v1262_v33 = vmul.f32 %v1260_v31, %v1252_v29 }
 0xa39   :  { %v1267_v34 = vadd.f32 %v1265_v32, %v1257_v26  ;;  %v1264_v35 = vmul.f32 0.044715, %v1262_v33 }
 0xa3b   :  { %v1269_v36 = vmul.f32 0.7978846, %v1267_v34  ;;  %v1266_v37 = vadd.f32 %v1264_v35, %v1252_v29 }
 0xa3d   :  { %3255 = vtanh.f32 %v1269_v36  ;;  %v1268_v38 = vmul.f32 0.7978846, %v1266_v37 }
 0xa3f   :  { %3257 = vtanh.f32 %v1268_v38 }
 0xa4a   :  { %v3256_v39 = vpop.eup %3255 }
 0xa4b   :  { %v1273_v40 = vadd.f32 1.0, %v3256_v39 }
 0xa4c   :  { %v3258_v41 = vpop.eup %3257 }
 0xa4d   :  { %v1272_v42 = vadd.f32 1.0, %v3258_v41  ;;  %v1275_v43 = vmul.f32 0.5, %v1273_v40 }
 0xa4f   :  { %v1274_v44 = vmul.f32 0.5, %v1272_v42  ;;  %v1277_v46 = vmul.f32 %v1275_v43, %v1257_v26 }
 0xa51   :  { %v1276_v45 = vmul.f32 %v1274_v44, %v1252_v29 }
 0xa53   :  { %3105 = vmatprep.mubr.msk.f32.mxu1 %vm1293_vm8, %v1276_v45 }
 0xa54   :  { %3106 = vmatmul.mubr.msk.f32.vlgmr.msra.gmra.mxu1 %vm1293_vm8, %v1277_v46 }
 0xa55   :  { %3131 = vmatprep.mubr.msk.f32.mxu1 %vm3339_vm5, %v3338_v16 }
 0xb14   :  { %v3107_v48 = vpop.f32.mrf.mxu1 }
 0xb15   :  { %v1372_v49 = vadd.f32 %v3107_v48, %v2811_v47 }
 0xb16   :  { %v1366_v50 = vpop.f32.mrf.mxu1 }
 0xb17   :  { %v1367_v51 = vadd.f32 %v2811_v47, %v1366_v50  ;;  %v1376_v52 = vadd.f32 %v1372_v49, %v1167_v10 }
 0xb19   :  { %v1382_v53 = vsel %vm187_vm4, %v1376_v52, 0.0  ;;  %v1375_v59 = vadd.f32 %v1367_v51, %v3684_v2 }
 0xb1a   :  { %1383 = vadd.xlane.f32.xlu0 %v1382_v53 }
 0xb1b   :  { %v1379_v57 = vsel %vm187_vm4, %v1375_v59, 0.0 }
 0xb1c   :  { %1380 = vadd.xlane.f32.xlu1 %v1379_v57 }
 0xba3   :  { %v1384_v54 = vpop.xlane.xlu0 %1383 }
 0xba4   :  { %v1386_v55 = vmul.f32 0.03125, %v1384_v54 }
 0xba5   :  { %v1381_v56 = vpop.xlane.xlu1 %1380 }
 0xba6   :  { %v1388_v58 = vsub.f32 %v1376_v52, %v1386_v55  ;;  %v1385_v60 = vmul.f32 0.03125, %v1381_v56 }
 0xba8   :  { %v1387_v61 = vsub.f32 %v1375_v59, %v1385_v60  ;;  %v1390_v62 = vmul.f32 %v1388_v58, %v1388_v58 }
 0xbaa   :  { %v1394_v63 = vsel %vm187_vm4, %v1390_v62, 0.0  ;;  %v1389_v3 = vmul.f32 %v1387_v61, %v1387_v61 }
 0xbab   :  { %1395 = vadd.xlane.f32.xlu0 %v1394_v63 }
 0xbac   :  { %v1391_v4 = vsel %vm187_vm4, %v1389_v3, 0.0 }
 0xbad   :  { %1392 = vadd.xlane.f32.xlu1 %v1391_v4 }
 0xc34   :  { %v1396_v8 = vpop.xlane.xlu0 %1395 }
 0xc35   :  { %v1398_v9 = vmul.f32 0.03125, %v1396_v8 }
 0xc36   :  { %v1393_v2 = vpop.xlane.xlu1 %1392 }
 0xc37   :  { %v1400_v0 = vadd.f32 1e-12, %v1398_v9  ;;  %v1397_v10 = vmul.f32 0.03125, %v1393_v2 }
 0xc39   :  { %3259 = vrsqrt.f32 %v1400_v0  ;;  %v1399_v11 = vadd.f32 1e-12, %v1397_v10 }
 0xc3b   :  { %3261 = vrsqrt.f32 %v1399_v11 }
 0xc46   :  { %v3260_v13 = vpop.eup %3259 }
 0xc47   :  { %v1404_v15 = vmul.f32 %v3260_v13, %v1388_v58 }
 0xc48   :  { %v3262_v19 = vpop.eup %3261 }
 0xc49   :  { %v1403_v20 = vmul.f32 %v3262_v19, %v1387_v61  ;;  %v1412_v21 = vmul.f32 %v2814_v14, %v1404_v15 }
 0xc4b   :  { %v1411_v24 = vmul.f32 %v2814_v14, %v1403_v20  ;;  %v3750_v26 = vadd.f32 %v2815_v22, %v1412_v21 }
 0xc4d   :  { %v3748_v25 = vadd.f32 %v2815_v22, %v1411_v24 }
 0xc4f   :  { %3116 = vmatprep.mubr.msk.f32.mxu0 %vm187_vm4, %v3748_v25 }
 0xc50   :  { %3117 = vmatmul.mubr.msk.f32.vlgmr.msra.gmra.mxu0 %vm187_vm4, %v3750_v26 }
 0xc51   :  { %3121 = vmatprep.mubr.msk.f32.mxu0 %vm3339_vm5, %v3338_v16 }
 0xd10   :  { %v3118_v28 = vpop.f32.mrf.mxu0 }
 0xd11   :  { %v3761_v29 = vadd.f32 %v3118_v28, %v2821_v17 }
 0xd12   :  { %v1506_v30 = vpop.f32.mrf.mxu0 }
 0xd13   :  { %v1507_v31 = vadd.f32 %v2821_v17, %v1506_v30  ;;  %1519 = vrot.lane.b32.xlu0 %v3761_v29, %s3340_s0 }
 0xd15   :  { %1517 = vrot.lane.b32.xlu1 %v1507_v31, %s3340_s0 }
 0xd19   :  { %1521 = vrot.lane.b32.xlu1 %v1507_v31, %s3341_s4 }
 0xd1d   :  { %1597 = vrot.lane.b32.xlu1 %v3761_v29, %s3341_s4 }
 0xd85   :  { %v3769_v32 = vpop.permute.xlu0 %1519 }
 0xd86   :  { %1749 = vrot.lane.b32.xlu1 %v3769_v32, %s3341_s4 }
 0xd87   :  { %v1518_v33 = vpop.permute.xlu1 %1517 }
 0xd88   :  { %1673 = vrot.lane.b32.xlu0 %v1518_v33, %s3341_s4 }
 0xd8b   :  { %v1522_v34 = vpop.permute.xlu1 %1521 }
 0xd8c   :  { %3120 = vmatpush3.xpose.msk.msra.mxu0 %vm368_vm6, %v1522_v34 }
 0xd8d   :  { %3124 = vmatprep.subr.mxu0 %v3338_v16 }
 0xd8f   :  { %3122 = vmatmul.mubr.msk.f32.vlgmr.msra.gmra.mxu0 %vm368_vm6, %v1507_v31  ;;  %v1598_v35 = vpop.permute.xlu1 %1597 }
 0xd90   :  { %3125 = vmatpush3.xpose.msk.msra.mxu0 %vm368_vm6, %v1598_v35  ;;  %3126 = vmatprep.mubr.msk.f32.mxu0 %vm3339_vm5, %v3338_v16  ;;  %v2837_v35 = vld [vmem:[%s3963_s8 + $0x28] sm:$0xff] }
 0xd91   :  { %3134 = vmatprep.subr.mxu0 %v3338_v16 }
 0xd93   :  { %3127 = vmatmul.mubr.msk.f32.vlgmr.msra.gmra.mxu0 %vm368_vm6, %v3761_v29 }
 0xd94   :  { %3136 = vmatprep.mubr.msk.f32.mxu0 %vm3339_vm5, %v3338_v16 }
 0xdf8   :  { %v1750_v36 = vpop.permute.xlu1 %1749 }
 0xdf9   :  { %3135 = vmatpush3.xpose.msk.msra.mxu0 %vm368_vm6, %v1750_v36  ;;  %v2836_v36 = vld [vmem:[%s3963_s8 + $0x20] sm:$0xff] }
 0xdfa   :  { %v1674_v37 = vpop.permute.xlu0 %1673  ;;  %3144 = vmatprep.subr.mxu0 %v3338_v16 }
 0xdfb   :  { %3130 = vmatpush3.xpose.msk.msra.mxu1 %vm368_vm6, %v1674_v37 }
 0xdfc   :  { %3137 = vmatmul.mubr.msk.f32.vlgmr.msra.gmra.mxu0 %vm368_vm6, %v3769_v32  ;;  %3139 = vmatprep.subr.mxu1 %v3338_v16 }
 0xdfd   :  { %3146 = vmatprep.mubr.msk.f32.mxu0 %vm3339_vm5, %v3338_v16 }
 0xdfe   :  { %3132 = vmatmul.mubr.msk.f32.vlgmr.msra.gmra.mxu1 %vm368_vm6, %v1518_v33 }
 0xdff   :  { %3141 = vmatprep.mubr.msk.f32.mxu1 %vm3339_vm5, %v3338_v16 }
 0xe4f   :  { %v1593_v38 = vpop.f32.mrf.mxu0 }
 0xe50   :  { %v1594_v39 = vadd.f32 %v1593_v38, %v3605_v23 }
 0xe51   :  { %v3123_v40 = vpop.f32.mrf.mxu0 }
 0xe52   :  { %v1825_v41 = vsel %vm671_vm7, %v1594_v39, -inf }
 0xe53   :  { %1826 = vmax.xlane.f32.xlu0 %v1825_v41  ;;  %v1669_v42 = vpop.f32.mrf.mxu0 }
 0xe54   :  { %v1670_v43 = vadd.f32 %v1669_v42, %v3608_v27 }
 0xe55   :  { %v3128_v44 = vpop.f32.mrf.mxu0 }
 0xe56   :  { %v1828_v45 = vsel %vm671_vm7, %v1670_v43, -inf }
 0xe57   :  { %1829 = vmax.xlane.f32.xlu1 %v1828_v45 }
 0xe68   :  { %1869 = vrot.lane.b32.xlu1 %v1507_v31, %s3343_s23  ;;  %v2839_v31 = vld [vmem:[%s3963_s8 + $0x38] sm:$0xff] }
 0xebc   :  { %v1821_v46 = vpop.f32.mrf.mxu0 }
 0xebd   :  { %v1822_v51 = vadd.f32 %v1821_v46, %v3608_v27 }
 0xebe   :  { %v1745_v47 = vpop.f32.mrf.mxu1  ;;  %v3138_v48 = vpop.f32.mrf.mxu0 }
 0xebf   :  { %v1746_v49 = vadd.f32 %v1745_v47, %v3605_v23  ;;  %v1834_v53 = vsel %vm671_vm7, %v1822_v51, -inf  ;;  %v2841_v47 = vld [vmem:[%s3964_s9 + $0x1] ss:$0 sm:$0xff] }
 0xec0   :  { %v3133_v50 = vpop.f32.mrf.mxu1 }
 0xec1   :  { %v1831_v52 = vsel %vm671_vm7, %v1746_v49, -inf }
 0xec2   :  { %1832 = vmax.xlane.f32.xlu0 %v1831_v52 }
 0xec6   :  { %1835 = vmax.xlane.f32.xlu0 %v1834_v53 }
 0xedc   :  { %v1827_v59 = vpop.xlane.xlu0 %1826 }
 0xedd   :  { %v1837_v57 = vsub.f32 %v1594_v39, %v1827_v59 }
 0xedf   :  { %v1841_v54 = vmul.f32 1.442695, %v1837_v57 }
 0xee0   :  { %v1830_v55 = vpop.xlane.xlu1 %1829 }
 0xee1   :  { %3263 = vpow2.f32 %v1841_v54  ;;  %v1838_v56 = vsub.f32 %v1670_v43, %v1830_v55 }
 0xee3   :  { %v1843_v58 = vmul.f32 1.442695, %v1838_v56 }
 0xee4   :  { %v1870_v60 = vpop.permute.xlu1 %1869 }
 0xee5   :  { %3265 = vpow2.f32 %v1843_v58  ;;  %3140 = vmatpush3.msra.mxu1 %v1870_v60 }
 0xee6   :  { %3149 = vmatprep.subr.mxu1 %v3338_v16 }
 0xeee   :  { %v3264_v23 = vpop.eup %3263 }
 0xeef   :  { %v1849_v27 = vsel %vm671_vm7, %v3264_v23, 0.0 }
 0xef0   :  { %1850 = vadd.xlane.f32.xlu1 %v1849_v27 }
 0xef2   :  { %v3266_v61 = vpop.eup %3265 }
 0xef3   :  { %v1852_v62 = vsel %vm671_vm7, %v3266_v61, 0.0 }
 0xef4   :  { %1853 = vadd.xlane.f32.xlu0 %v1852_v62 }
 0xf01   :  { %2021 = vrot.lane.b32.xlu1 %v1518_v33, %s3343_s23 }
 0xf4b   :  { %v1833_v63 = vpop.xlane.xlu0 %1832 }
 0xf4c   :  { %v1839_v3 = vsub.f32 %v1746_v49, %v1833_v63  ;;  %v2850_v63 = vld [vmem:[%s3967_s12 + $0x30] sm:$0xff] }
 0xf4e   :  { %v1845_v4 = vmul.f32 1.442695, %v1839_v3  ;;  %v2849_v3 = vld [vmem:[%s3967_s12 + $0x28] sm:$0xff] }
 0xf4f   :  { %v1836_v5 = vpop.xlane.xlu0 %1835 }
 0xf50   :  { %3267 = vpow2.f32 %v1845_v4  ;;  %v1840_v6 = vsub.f32 %v1822_v51, %v1836_v5  ;;  %v2848_v4 = vld [vmem:[%s3967_s12 + $0x20] sm:$0xff] }
 0xf52   :  { %v1847_v7 = vmul.f32 1.442695, %v1840_v6 }
 0xf54   :  { %3269 = vpow2.f32 %v1847_v7 }
 0xf5d   :  { %v3268_v1 = vpop.eup %3267 }
 0xf5e   :  { %v1855_v8 = vsel %vm671_vm7, %v3268_v1, 0.0 }
 0xf5f   :  { %1856 = vadd.xlane.f32.xlu1 %v1855_v8 }
 0xf61   :  { %v3270_v9 = vpop.eup %3269 }
 0xf62   :  { %v1858_v2 = vsel %vm671_vm7, %v3270_v9, 0.0 }
 0xf63   :  { %1859 = vadd.xlane.f32.xlu0 %v1858_v2 }
 0xf70   :  { %2097 = vrot.lane.b32.xlu1 %v3769_v32, %s3343_s23  ;;  %v2838_v32 = vld [vmem:[%s3963_s8 + $0x30] sm:$0xff] }
 0xf79   :  { %1945 = vrot.lane.b32.xlu0 %v3761_v29, %s3343_s23  ;;  %v1851_v0 = vpop.xlane.xlu1 %1850 }
 0xf7a   :  { %3271 = vrcp.f32 %v1851_v0  ;;  %v2846_v0 = vld [vmem:[%s3965_s10 + $0x1] ss:$0 sm:$0xff] }
 0xf7d   :  { %v2022_v13 = vpop.permute.xlu1 %2021  ;;  %v1854_v14 = vpop.xlane.xlu0 %1853 }
 0xf7e   :  { %3273 = vrcp.f32 %v1854_v14 }
 0xf87   :  { %v3272_v10 = vpop.eup %3271 }
 0xf88   :  { %v1865_v11 = vmul.f32 %v3272_v10, %v3264_v23 }
 0xf8a   :  { %3142 = vmatmul.mubr.msk.f32.vlgmr.msra.gmra.mxu1 %vm671_vm7, %v1865_v11  ;;  %v2847_v11 = vld [vmem:[%s3966_s11 + $0x1] ss:$0 sm:$0xff] }
 0xf8b   :  { %3150 = vmatpush3.msra.mxu1 %v2022_v13  ;;  %3151 = vmatprep.mubr.msk.f32.mxu1 %vm3339_vm5, %v3338_v16  ;;  %v3274_v20 = vpop.eup %3273 }
 0xf8c   :  { %v1866_v22 = vmul.f32 %v3274_v20, %v3266_v61  ;;  %3159 = vmatprep.subr.mxu1 %v2839_v31 }
 0xfe8   :  { %v1857_v15 = vpop.xlane.xlu1 %1856 }
 0xfe9   :  { %3275 = vrcp.f32 %v1857_v15 }
 0xfec   :  { %v1860_v19 = vpop.xlane.xlu0 %1859  ;;  %v2098_v24 = vpop.permute.xlu1 %2097 }
 0xfed   :  { %3277 = vrcp.f32 %v1860_v19 }
 0xff0   :  { %v1946_v21 = vpop.permute.xlu0 %1945 }
 0xff1   :  { %3145 = vmatpush3.msra.mxu0 %v1946_v21 }
 0xff2   :  { %3147 = vmatmul.mubr.msk.f32.vlgmr.msra.gmra.mxu0 %vm671_vm7, %v1866_v22  ;;  %3154 = vmatprep.subr.mxu0 %v3338_v16  ;;  %v2863_v22 = vld [vmem:[%s3969_s14 + $0x78] sm:$0xff] }
 0xff3   :  { %3155 = vmatpush3.msra.mxu0 %v2098_v24  ;;  %3156 = vmatprep.mubr.msk.f32.mxu0 %vm3339_vm5, %v3338_v16  ;;  %v2862_v24 = vld [vmem:[%s3969_s14 + $0x70] sm:$0xff] }
 0xff6   :  { %v3276_v17 = vpop.eup %3275 }
 0xff7   :  { %v1867_v28 = vmul.f32 %v3276_v17, %v3268_v1  ;;  %v2861_v17 = vld [vmem:[%s3969_s14 + $0x68] sm:$0xff] }
 0xff9   :  { %3152 = vmatmul.mubr.msk.f32.vlgmr.msra.gmra.mxu1 %vm671_vm7, %v1867_v28  ;;  %v2860_v28 = vld [vmem:[%s3969_s14 + $0x60] sm:$0xff] }
 0xffa   :  { %v3278_v29 = vpop.eup %3277  ;;  %3160 = vmatpush3.msra.mxu1 %v2839_v31  ;;  %v2857_v31 = vld [vmem:[%s3969_s14 + $0x48] sm:$0xff] }
 0xffb   :  { %v1868_v30 = vmul.f32 %v3278_v29, %v3270_v9  ;;  %3161 = vmatprep.subr.mxu1 %v2838_v32  ;;  %v2859_v29 = vld [vmem:[%s3969_s14 + $0x58] sm:$0xff] }
 0xffc   :  { %3162 = vmatpush3.msra.mxu1 %v2838_v32  ;;  %v2856_v32 = vld [vmem:[%s3969_s14 + $0x40] sm:$0xff] }
 0xffd   :  { %3157 = vmatmul.mubr.msk.f32.vlgmr.msra.gmra.mxu0 %vm671_vm7, %v1868_v30  ;;  %3163 = vmatprep.subr.mxu1 %v2837_v35  ;;  %v2858_v30 = vld [vmem:[%s3969_s14 + $0x50] sm:$0xff] }
 0xffe   :  { %3164 = vmatpush3.msra.mxu1 %v2837_v35 }
 0xfff   :  { %3165 = vmatprep.subr.mxu1 %v2836_v36 }
0x1000   :  { %3166 = vmatpush3.msra.mxu1 %v2836_v36 }
0x1001   :  { %3181 = vmatprep.subr.mxu1 %v2863_v22 }
0x104a   :  { %v1941_v33 = vpop.f32.mrf.mxu1 }
0x104c   :  { %v3143_v34 = vpop.f32.mrf.mxu1 }
0x10b2   :  { %v2017_v37 = vpop.f32.mrf.mxu0 }
0x10b4   :  { %v3148_v38 = vpop.f32.mrf.mxu0 }
0x10b9   :  { %v2093_v39 = vpop.f32.mrf.mxu1 }
0x10ba   :  { %2175 = vrot.lane.b32.xlu0 %v2093_v39, %s3344_s29 }
0x10bb   :  { %v3153_v40 = vpop.f32.mrf.mxu1 }
0x10bd   :  { %v2169_v41 = vpop.f32.mrf.mxu0 }
0x10be   :  { %2177 = vrot.lane.b32.xlu1 %v2169_v41, %s3344_s29 }
0x10bf   :  { %v3158_v42 = vpop.f32.mrf.mxu0 }
0x112c   :  { %v2176_v43 = vpop.permute.xlu0 %2175 }
0x112d   :  { %v2181_v44 = vsel %vm368_vm6, %v1941_v33, %v2176_v43  ;;  %v2853_v33 = vld [vmem:[%s3968_s13 + $0x1] ss:$0 sm:$0xff] }
0x112e   :  { %3167 = vmatprep.mubr.msk.f32.mxu1 %vm187_vm4, %v2181_v44 }
0x1130   :  { %v2178_v45 = vpop.permute.xlu1 %2177 }
0x1131   :  { %v2182_v46 = vsel %vm368_vm6, %v2017_v37, %v2178_v45 }
0x1132   :  { %3168 = vmatmul.mubr.msk.f32.vlgmr.msra.gmra.mxu1 %vm187_vm4, %v2182_v46 }
0x1133   :  { %3182 = vmatpush3.msra.mxu1 %v2863_v22  ;;  %v2871_v22 = vld [vmem:[%s3972_s17 + $0x1] ss:$0 sm:$0xff] }
0x1134   :  { %3183 = vmatprep.subr.mxu1 %v2862_v24 }
0x1135   :  { %3184 = vmatpush3.msra.mxu1 %v2862_v24 }
0x1136   :  { %3185 = vmatprep.subr.mxu1 %v2861_v17 }
0x1137   :  { %3186 = vmatpush3.msra.mxu1 %v2861_v17 }
0x1138   :  { %3187 = vmatprep.subr.mxu1 %v2860_v28 }
0x1139   :  { %3188 = vmatpush3.msra.mxu1 %v2860_v28 }
0x113a   :  { %3189 = vmatprep.subr.mxu1 %v2859_v29 }
0x113b   :  { %3190 = vmatpush3.msra.mxu1 %v2859_v29 }
0x113c   :  { %3191 = vmatprep.subr.mxu1 %v2858_v30 }
0x113d   :  { %3192 = vmatpush3.msra.mxu1 %v2858_v30 }
0x113e   :  { %3193 = vmatprep.subr.mxu1 %v2857_v31 }
0x113f   :  { %3194 = vmatpush3.msra.mxu1 %v2857_v31 }
0x1140   :  { %3195 = vmatprep.subr.mxu1 %v2856_v32 }
0x1141   :  { %3196 = vmatpush3.msra.mxu1 %v2856_v32  ;;  %v2665_v32 = vld [vmem:[%s3973_s18 + $0x8] sm:$0xff] }
0x11f2   :  { %v3169_v48 = vpop.f32.mrf.mxu1 }
0x11f3   :  { %v2274_v49 = vadd.f32 %v3169_v48, %v2841_v47 }
0x11f4   :  { %v2268_v50 = vpop.f32.mrf.mxu1 }
0x11f5   :  { %v2269_v51 = vadd.f32 %v2841_v47, %v2268_v50  ;;  %v2278_v52 = vadd.f32 %v2274_v49, %v3750_v26 }
0x11f7   :  { %v2286_v53 = vsel %vm187_vm4, %v2278_v52, 0.0  ;;  %v2277_v59 = vadd.f32 %v2269_v51, %v3748_v25  ;;  %v2851_v25 = vld [vmem:[%s3967_s12 + $0x38] sm:$0xff] }
0x11f8   :  { %2287 = vadd.xlane.f32.xlu1 %v2286_v53  ;;  %3170 = vmatprep.subr.mxu0 %v2851_v25 }
0x11f9   :  { %v2283_v57 = vsel %vm187_vm4, %v2277_v59, 0.0  ;;  %3171 = vmatpush3.msra.mxu0 %v2851_v25 }
0x11fa   :  { %2284 = vadd.xlane.f32.xlu0 %v2283_v57  ;;  %3172 = vmatprep.subr.mxu0 %v2850_v63 }
0x11fb   :  { %3173 = vmatpush3.msra.mxu0 %v2850_v63 }
0x11fc   :  { %3174 = vmatprep.subr.mxu0 %v2849_v3 }
0x11fd   :  { %3175 = vmatpush3.msra.mxu0 %v2849_v3 }
0x11fe   :  { %3176 = vmatprep.subr.mxu0 %v2848_v4 }
0x11ff   :  { %3177 = vmatpush3.msra.mxu0 %v2848_v4 }
0x1200   :  { %3200 = vmatprep.subr.mxu0 %v3338_v16 }
0x1281   :  { %v2288_v54 = vpop.xlane.xlu1 %2287 }
0x1282   :  { %v2290_v55 = vmul.f32 0.03125, %v2288_v54  ;;  %v2865_v54 = vld [vmem:[%s3970_s15 + $0x1] ss:$0 sm:$0xff] }
0x1283   :  { %v2285_v56 = vpop.xlane.xlu0 %2284 }
0x1284   :  { %v2289_v58 = vmul.f32 0.03125, %v2285_v56  ;;  %v2292_v60 = vsub.f32 %v2278_v52, %v2290_v55 }
0x1286   :  { %v2291_v23 = vsub.f32 %v2277_v59, %v2289_v58  ;;  %v2294_v62 = vmul.f32 %v2292_v60, %v2292_v60 }
0x1288   :  { %v2293_v27 = vmul.f32 %v2291_v23, %v2291_v23  ;;  %v2298_v26 = vsel %vm187_vm4, %v2294_v62, 0.0 }
0x128a   :  { %v2295_v61 = vsel %vm187_vm4, %v2293_v27, 0.0 }
0x128b   :  { %2296 = vadd.xlane.f32.xlu0 %v2295_v61 }
0x128f   :  { %2299 = vadd.xlane.f32.xlu0 %v2298_v26 }
0x1314   :  { %v2297_v5 = vpop.xlane.xlu0 %2296 }
0x1315   :  { %v2301_v6 = vmul.f32 0.03125, %v2297_v5 }
0x1317   :  { %v2303_v7 = vadd.f32 1e-12, %v2301_v6 }
0x1318   :  { %v2300_v1 = vpop.xlane.xlu0 %2299 }
0x1319   :  { %3279 = vrsqrt.f32 %v2303_v7  ;;  %v2302_v8 = vmul.f32 0.03125, %v2300_v1 }
0x131b   :  { %v2304_v9 = vadd.f32 1e-12, %v2302_v8 }
0x131d   :  { %3281 = vrsqrt.f32 %v2304_v9 }
0x1326   :  { %v3280_v2 = vpop.eup %3279 }
0x1327   :  { %v2307_v10 = vmul.f32 %v3280_v2, %v2291_v23 }
0x1329   :  { %v2315_v13 = vmul.f32 %v2846_v0, %v2307_v10 }
0x132a   :  { %v3282_v14 = vpop.eup %3281 }
0x132b   :  { %v2308_v15 = vmul.f32 %v3282_v14, %v2292_v60  ;;  %v3870_v19 = vadd.f32 %v2847_v11, %v2315_v13 }
0x132d   :  { %v2316_v20 = vmul.f32 %v2846_v0, %v2308_v15  ;;  %3178 = vmatprep.mubr.msk.f32.mxu0 %vm187_vm4, %v3870_v19  ;;  %v2870_v15 = vld [vmem:[%s3971_s16 + $0x1] ss:$0 sm:$0xff] }
0x132f   :  { %v2324_v21 = vadd.f32 %v2847_v11, %v2316_v20 }
0x1331   :  { %3179 = vmatmul.mubr.msk.f32.vlgmr.msra.gmra.mxu0 %vm187_vm4, %v2324_v21 }
0x1332   :  { %3204 = vmatprep.mubr.msk.f32.mxu0 %vm3339_vm5, %v3338_v16 }
0x13f1   :  { %v3180_v34 = vpop.f32.mrf.mxu0 }
0x13f2   :  { %v2416_v35 = vadd.f32 %v3180_v34, %v2853_v33 }
0x13f3   :  { %v2410_v36 = vpop.f32.mrf.mxu0 }
0x13f4   :  { %v2420_v37 = vmul.f32 %v2416_v35, %v2416_v35  ;;  %v2411_v38 = vadd.f32 %v2853_v33, %v2410_v36  ;;  %v2664_v33 = vld [vmem:[%s3973_s18] sm:$0xff] }
0x13f6   :  { %v2422_v39 = vmul.f32 %v2420_v37, %v2416_v35  ;;  %v2419_v40 = vmul.f32 %v2411_v38, %v2411_v38 }
0x13f8   :  { %v2424_v41 = vmul.f32 0.044715, %v2422_v39  ;;  %v2421_v42 = vmul.f32 %v2419_v40, %v2411_v38 }
0x13fa   :  { %v2426_v43 = vadd.f32 %v2424_v41, %v2416_v35  ;;  %v2423_v44 = vmul.f32 0.044715, %v2421_v42 }
0x13fc   :  { %v2428_v45 = vmul.f32 0.7978846, %v2426_v43  ;;  %v2425_v46 = vadd.f32 %v2423_v44, %v2411_v38 }
0x13fe   :  { %3283 = vtanh.f32 %v2428_v45  ;;  %v2427_v47 = vmul.f32 0.7978846, %v2425_v46 }
0x1400   :  { %3285 = vtanh.f32 %v2427_v47 }
0x140b   :  { %v3284_v48 = vpop.eup %3283 }
0x140c   :  { %v2432_v49 = vadd.f32 1.0, %v3284_v48 }
0x140d   :  { %v3286_v50 = vpop.eup %3285 }
0x140e   :  { %v2431_v51 = vadd.f32 1.0, %v3286_v50  ;;  %v2434_v52 = vmul.f32 0.5, %v2432_v49 }
0x1410   :  { %v2433_v53 = vmul.f32 0.5, %v2431_v51  ;;  %v2436_v57 = vmul.f32 %v2434_v52, %v2416_v35 }
0x1412   :  { %v2435_v59 = vmul.f32 %v2433_v53, %v2411_v38 }
0x1414   :  { %3197 = vmatprep.mubr.msk.f32.mxu1 %vm1293_vm8, %v2435_v59 }
0x1415   :  { %3198 = vmatmul.mubr.msk.f32.vlgmr.msra.gmra.mxu1 %vm1293_vm8, %v2436_v57 }
0x14d5   :  { %v3199_v55 = vpop.f32.mrf.mxu1 }
0x14d6   :  { %v2532_v56 = vadd.f32 %v3199_v55, %v2865_v54 }
0x14d7   :  { %v2526_v58 = vpop.f32.mrf.mxu1 }
0x14d8   :  { %v2527_v60 = vadd.f32 %v2865_v54, %v2526_v58  ;;  %v2536_v23 = vadd.f32 %v2532_v56, %v2324_v21 }
0x14da   :  { %v2544_v27 = vsel %vm187_vm4, %v2536_v23, 0.0  ;;  %v2535_v61 = vadd.f32 %v2527_v60, %v3870_v19  ;;  %v2587_v19 = vmul.u32 8, %v3601_v12  ;;  %v2667_v12 = vld [vmem:[%s3973_s18 + $0x18] sm:$0xff] }
0x14db   :  { %2545 = vadd.xlane.f32.xlu1 %v2544_v27 }
0x14dc   :  { %v2541_v62 = vsel %vm187_vm4, %v2535_v61, 0.0  ;;  %vm2588_vm9 = vcmp.eq.s32.totalorder %v3506_v18, %v2587_v19  ;;  %v2666_v18 = vld [vmem:[%s3973_s18 + $0x10] sm:$0xff] }
0x14dd   :  { %2542 = vadd.xlane.f32.xlu0 %v2541_v62  ;;  %v2872_v31 = vsel %vm2588_vm9, 1.0, %v3338_v16 }
0x1564   :  { %v2546_v26 = vpop.xlane.xlu1 %2545 }
0x1565   :  { %v2548_v25 = vmul.f32 0.03125, %v2546_v26 }
0x1566   :  { %v2543_v63 = vpop.xlane.xlu0 %2542 }
0x1567   :  { %v2550_v3 = vsub.f32 %v2536_v23, %v2548_v25  ;;  %v2547_v4 = vmul.f32 0.03125, %v2543_v63 }
0x1569   :  { %v2549_v5 = vsub.f32 %v2535_v61, %v2547_v4  ;;  %v2552_v6 = vmul.f32 %v2550_v3, %v2550_v3 }
0x156b   :  { %v2556_v7 = vsel %vm187_vm4, %v2552_v6, 0.0  ;;  %v2551_v1 = vmul.f32 %v2549_v5, %v2549_v5 }
0x156c   :  { %2557 = vadd.xlane.f32.xlu1 %v2556_v7 }
0x156d   :  { %v2553_v8 = vsel %vm187_vm4, %v2551_v1, 0.0 }
0x156e   :  { %2554 = vadd.xlane.f32.xlu0 %v2553_v8 }
0x15f5   :  { %v2558_v9 = vpop.xlane.xlu1 %2557 }
0x15f6   :  { %v2560_v2 = vmul.f32 0.03125, %v2558_v9 }
0x15f7   :  { %v2555_v0 = vpop.xlane.xlu0 %2554 }
0x15f8   :  { %v2562_v10 = vadd.f32 1e-12, %v2560_v2  ;;  %v2559_v11 = vmul.f32 0.03125, %v2555_v0 }
0x15fa   :  { %3287 = vrsqrt.f32 %v2562_v10  ;;  %v2561_v13 = vadd.f32 1e-12, %v2559_v11 }
0x15fc   :  { %3289 = vrsqrt.f32 %v2561_v13 }
0x1607   :  { %v3288_v14 = vpop.eup %3287 }
0x1608   :  { %v2566_v20 = vmul.f32 %v3288_v14, %v2550_v3 }
0x1609   :  { %v3290_v21 = vpop.eup %3289 }
0x160a   :  { %v2574_v24 = vmul.f32 %v2870_v15, %v2566_v20  ;;  %v2565_v17 = vmul.f32 %v3290_v21, %v2549_v5 }
0x160c   :  { %v2582_v28 = vadd.f32 %v2871_v22, %v2574_v24  ;;  %v2573_v29 = vmul.f32 %v2870_v15, %v2565_v17 }
0x160e   :  { %3201 = vmatpush3.msra.mxu0 %v2582_v28  ;;  %2584 = vst.msk [vmem:[#allocation2 + $0x8] sm:$0xff] %vm187_vm4, %v2582_v28  ;;  %v2581_v30 = vadd.f32 %v2871_v22, %v2573_v29 }
0x160f   :  { %3202 = vmatprep.subr.mxu0 %v3338_v16 }
0x1610   :  { %3203 = vmatpush3.msra.mxu0 %v2581_v30  ;;  %2583 = vst.msk [vmem:[#allocation2] sm:$0xff] %vm187_vm4, %v2581_v30 }
0x1611   :  { %3205 = vmatmul.mubr.msk.f32.vlgmr.msra.gmra.mxu0 %vm368_vm6, %v2872_v31  ;;  %3207 = vmatprep.subr.mxu0 %v3338_v16 }
0x1612   :  { %3208 = vmatpush3.msra.mxu0 %v2667_v12  ;;  %3215 = vmatprep.mubr.msk.f32.mxu0 %vm3339_vm5, %v3338_v16 }
0x1613   :  { %3209 = vmatprep.subr.mxu0 %v3338_v16 }
0x1614   :  { %3210 = vmatpush3.msra.mxu0 %v2666_v18 }
0x1615   :  { %3211 = vmatprep.subr.mxu0 %v3338_v16 }
0x1616   :  { %3212 = vmatpush3.msra.mxu0 %v2665_v32 }
0x1617   :  { %3213 = vmatprep.subr.mxu0 %v3338_v16 }
0x1618   :  { %3214 = vmatpush3.msra.mxu0 %v2664_v33 }
0x16d1   :  { %v2660_v34 = vpop.f32.mrf.mxu0 }
0x16d2   :  { %3216 = vmatmul.mubr.msk.f32.vlgmr.msra.gmra.mxu0 %vm187_vm4, %v2660_v34 }
0x16d3   :  { %v3206_v35 = vpop.f32.mrf.mxu0 }
0x16d4   :  { %3304 = shalt.err (!%p3301_p4)
}
0x16d5   :  { %s3346_s8 = smov 128   ;;  %s3347_s27 = smov 8   ;;  %v2874_v16 = vld [vmem:[%s3974_s19] ss:$0 sm:$0xff]  ;;  %vm2749_vm10 = vcmask 254976  }
0x16d6   :  { %2762 = dma.vmem_to_hbm [thread:$0]  %s2757_s2, 256, %s3975_s20, [#allocation3], %s3346_s8, %s3346_s8, %s3347_s27  }
0x16d7   :  { %s3348_s26 = smov [#allocation4]  }
0x16d8   :  { %s2769_s3 = sshll.u32 %s3348_s26, 4  ;;  %s2770_s3 = int_to_ptr.vmem [resolvable:$true] %s2769_s3 }
0x16d9   :  { %s3313_s6 = scalar_lea.vmem %s2770_s3, 32  ;;  %p3318_p6 = scmp.lt.s32.totalorder %s2770_s3, %s2770_s3 }
0x16da   :  { %p3314_p5 = scmp.ne.s32.totalorder %s2770_s3, %s3313_s6  ;;  %p3319_p7 = scmp.lt.s32.totalorder %s3313_s6, %s3313_s6 }
0x16dc   :  { %p3320_p8 = por %p3319_p7, %p3318_p6 }
0x16de   :  { %p3321_p9 = pnand %p3320_p8, %p3314_p5 }
0x1792   :  { %v2744_v36 = vpop.f32.mrf.mxu0 }
0x1793   :  { %v2745_v37 = vadd.f32 %v2874_v16, %v2744_v36 }
0x1794   :  { %v3217_v38 = vpop.f32.mrf.mxu0 }
0x1795   :  { %3291 = vtanh.f32 %v2745_v37 }
0x17a2   :  { %v3292_v39 = vpop.eup %3291 }
0x17a3   :  { %2750 = vst.msk [vmem:[#allocation4] sm:$0x3] %vm2749_vm10, %v3292_v39 }
0x17a4   :  { %3324 = shalt.err (!%p3321_p9)
}
0x17a5   :  { %2772 = dma.vmem_to_hbm [thread:$0]  %s2770_s3, 32, %s3976_s21, [#allocation5]  }
0x17a6   :  { %3333 = dma.done.wait [#allocation3], 256  }
0x17a7   :  { %3334 = vsyncadd [#allocation3], 4294967040 }
0x17a8   :  { %3335 = dma.done.wait [#allocation5], 32  }
0x17a9   :  { %3336 = vsyncadd [#allocation5], 4294967264 }
0x17aa   :  { %2779 = vsyncpa [#allocation3], 1 }
0x17ab   :  { %2780 = vsyncpa [#allocation5], 1 }

</bundles_post_ra>
